<compile_context>
chip_gen: v6e
topology: v6e:2x2x1
jax: 0.10.0
libtpu: 0.0.40
codegen_flags: <defaults>
</compile_context>

<pallas_src>
import functools

import jax
import jax.numpy as jnp
from jax import lax
from jax.experimental import pallas as pl
from jax.experimental.pallas import tpu as pltpu


# Fixed, non-trainable parameters from FiniteDist.__init__ (requires_grad=False).
MAX_LOGVAR = 0.5     # th.ones((1, msg_dim)) / 2
MIN_LOGVAR = -10.0   # -th.ones((1, msg_dim)) * 10


def _finite_dist_kernel(x_ref, w_ref, b_ref, out_ref, *, msg_dim):
    """Per head h: out[:, h*2m : h*2m+m]   = tanh(x @ W1_h + b1_h)
                   out[:, h*2m+m : (h+1)*2m] = clamped_logvar(x @ W2_h + b2_h)."""
    # One fused MXU matmul over all heads; f32 accumulator regardless of input dtype.
    y = jnp.dot(x_ref[...], w_ref[...], preferred_element_type=jnp.float32)
    y = y + b_ref[...]                                        # (block_b, out_dim) f32

    # Lane mask picks mean lanes vs logvar lanes -> one dense store, no concat.
    col = lax.broadcasted_iota(jnp.int32, y.shape, dimension=1)
    is_mean = (col % (2 * msg_dim)) < msg_dim

    mean = jnp.tanh(y)                                        # limit=True branch
    logvar = MAX_LOGVAR - jax.nn.softplus(MAX_LOGVAR - y)
    logvar = MIN_LOGVAR + jax.nn.softplus(logvar - MIN_LOGVAR)

    out_ref[...] = jnp.where(is_mean, mean, logvar).astype(out_ref.dtype)


def _round_up(a, m):
    return (a + m - 1) // m * m


def fuse_finite_dist_heads(heads):
    """Fuse N FiniteDist heads that share the same input.

    heads: list of (w1, b1, w2, b2); each w is (in_dim, msg_dim) -- i.e. already
           transposed from PyTorch's nn.Linear (out_features, in_features) layout.
    Returns (w_fused, b_fused, msg_dim) with layout per head [mean_h | logvar_h],
    heads concatenated along the last axis.
    """
    msg_dim = heads[0][0].shape[1]
    ws, bs = [], []
    for w1, b1, w2, b2 in heads:
        assert w1.shape == w2.shape and w1.shape[1] == msg_dim
        ws.append(jnp.concatenate([w1, w2], axis=1))
        bs.append(jnp.concatenate([b1.reshape(-1), b2.reshape(-1)]))
    w = jnp.concatenate(ws, axis=1)
    b = jnp.concatenate(bs).reshape(1, -1)
    return w, b, msg_dim


def finite_dist_forward(x, w_fused, b_fused, msg_dim, *, block_b=512,
                        compute_dtype=jnp.bfloat16, out_dtype=jnp.float32,
                        interpret=False):
    """Fused FiniteDist forward for all heads packed in w_fused/b_fused.

    x:       (..., in_dim)                       any leading dims (bs, ts, n_agents)
    w_fused: (in_dim, n_heads * 2*msg_dim)
    b_fused: (1, n_heads * 2*msg_dim)
    returns: (..., n_heads * 2*msg_dim), per head [tanh(mean) | clamped_logvar].
    """
    in_dim, out_dim = w_fused.shape
    assert out_dim % (2 * msg_dim) == 0

    lead_shape = x.shape[:-1]
    x2 = x.reshape(-1, in_dim)
    b = x2.shape[0]

    # Narrow the bandwidth-dominant operands; accumulation stays f32 in-kernel.
    if compute_dtype is not None:
        x2 = x2.astype(compute_dtype)
        w_fused = w_fused.astype(compute_dtype)
    b_fused = b_fused.astype(jnp.float32)

    x_item = jnp.dtype(x2.dtype).itemsize
    w_item = jnp.dtype(w_fused.dtype).itemsize
    o_item = jnp.dtype(out_dtype).itemsize

    # Sublane-aligned batch block (16 rows for 2-byte dtypes, 8 for f32), clamped
    # to the problem so small batches run as a single grid step.  No host padding:
    # Pallas masks the partial boundary block.
    sub = max(8, 32 // min(x_item, o_item))
    blk = max(sub, min(_round_up(block_b, sub), _round_up(b, sub)))
    grid = (pl.cdiv(b, blk),)

    # Only raise the scoped-VMEM limit when the double-buffered tiles would not
    # fit v5e's 16 MiB default (keeps v7x's smaller 64 MiB physical VMEM safe).
    vmem_est = (2 * blk * in_dim * x_item          # x tiles (double-buffered)
                + 2 * blk * out_dim * o_item       # out tiles (double-buffered)
                + 2 * in_dim * out_dim * w_item    # resident weight (x2 buffers)
                + 2 * out_dim * 4)                 # bias
    vmem_limit = int(min(1.5 * vmem_est, 48 * 2 ** 20)) if vmem_est > 12 * 2 ** 20 else None

    cost = pl.CostEstimate(
        flops=2 * b * in_dim * out_dim,
        transcendentals=5 * b * out_dim,
        bytes_accessed=b * in_dim * x_item + b * out_dim * o_item
                       + in_dim * out_dim * w_item + out_dim * 4,
    )

    out = pl.pallas_call(
        functools.partial(_finite_dist_kernel, msg_dim=msg_dim),
        out_shape=jax.ShapeDtypeStruct((b, out_dim), out_dtype),
        grid=grid,
        in_specs=[
            pl.BlockSpec((blk, in_dim), lambda i: (i, 0)),     # x tile, pipelined
            pl.BlockSpec((in_dim, out_dim), lambda i: (0, 0)),  # fused weights, resident
            pl.BlockSpec((1, out_dim), lambda i: (0, 0)),       # fused bias, resident
        ],
        out_specs=pl.BlockSpec((blk, out_dim), lambda i: (i, 0)),
        compiler_params=pltpu.CompilerParams(
            dimension_semantics=("parallel",),                  # megacore sharding on v7x
            vmem_limit_bytes=vmem_limit,
        ),
        cost_estimate=cost,
        interpret=interpret,
    )(x2, w_fused, b_fused)

    return out.reshape(*lead_shape, out_dim)


def finite_dist_reference(x, w1, b1, w2, b2):
    """Pure-JAX reference mirroring PyTorch FiniteDist.forward (limit=True)."""
    mean = jnp.tanh(x @ w1 + b1)
    logvar = x @ w2 + b2
    logvar = MAX_LOGVAR - jax.nn.softplus(MAX_LOGVAR - logvar)
    logvar = MIN_LOGVAR + jax.nn.softplus(logvar - MIN_LOGVAR)
    return jnp.concatenate([mean, logvar], axis=-1)


if __name__ == "__main__":
    # Head applied over all (batch, time, agent) positions at once, like fc_msg(hs)
    # with hs of shape (bs, ts, n_agents, rnn_hidden_dim).
    bsz, ts, n_agents = 4, 8, 8          # B = bsz*ts*n_agents = 256
    in_dim, msg_dim = 64, 32             # rnn_hidden_dim=64, msg_dim=32
    n_heads = 2                          # two FiniteDist heads on hs -> 128 output lanes
    out_dim = n_heads * 2 * msg_dim

    key = jax.random.PRNGKey(0)
    kx, *kp = jax.random.split(key, 1 + 4 * n_heads)

    x = jax.random.normal(kx, (bsz, ts, n_agents, in_dim), dtype=jnp.float32)

    # Deterministic "nn.Linear"-style init (uniform in +/- 1/sqrt(in_dim)),
    # weights already stored as (in_dim, msg_dim) == PyTorch weight.T.
    bound = 1.0 / float(jnp.sqrt(jnp.float32(in_dim)))
    heads = []
    for h in range(n_heads):
        k1, k2, k3, k4 = kp[4 * h:4 * h + 4]
        heads.append((
            jax.random.uniform(k1, (in_dim, msg_dim), jnp.float32, -bound, bound),
            jax.random.uniform(k2, (msg_dim,), jnp.float32, -bound, bound),
            jax.random.uniform(k3, (in_dim, msg_dim), jnp.float32, -bound, bound),
            jax.random.uniform(k4, (msg_dim,), jnp.float32, -bound, bound),
        ))

    w_fused, b_fused, msg_dim_f = fuse_finite_dist_heads(heads)
    assert msg_dim_f == msg_dim

    ref = jnp.concatenate([finite_dist_reference(x, *hd) for hd in heads], axis=-1)

    # 1) Exact-semantics path (f32 inputs) -> tight tolerance.
    out_f32 = finite_dist_forward(x, w_fused, b_fused, msg_dim,
                                  compute_dtype=jnp.float32)
    out_f32 = jax.block_until_ready(out_f32)
    assert out_f32.shape == (bsz, ts, n_agents, out_dim)
    assert jnp.allclose(out_f32, ref, atol=1e-5, rtol=1e-5), "f32 mismatch vs reference"

    # 2) Bandwidth-optimized path (bf16 x/W, f32 accumulate) -> bf16 rounding tolerance.
    out_bf16 = finite_dist_forward(x, w_fused, b_fused, msg_dim,
                                   compute_dtype=jnp.bfloat16)
    out_bf16 = jax.block_until_ready(out_bf16)
    assert out_bf16.shape == (bsz, ts, n_agents, out_dim)
    assert jnp.allclose(out_bf16, ref, atol=3e-2, rtol=3e-2), "bf16 mismatch vs reference"

    print("KERNEL_OK")
</pallas_src>

<mosaic_0001>
module attributes {stable_mosaic.version = 11 : i64} {
  func.func @_finite_dist_kernel(%arg0: i32, %arg1: memref<256x64xf32, #tpu.memory_space<vmem>>, %arg2: memref<64x128xf32, #tpu.memory_space<vmem>>, %arg3: memref<1x128xf32, #tpu.memory_space<vmem>>, %arg4: memref<256x128xf32, #tpu.memory_space<vmem>>) attributes {dimension_semantics = [#tpu.dimension_semantics<parallel>], iteration_bounds = array<i64: 1>, scalar_prefetch = 0 : i64, scratch_operands = 0 : i64, tpu.core_type = #tpu.core_type<tc>, window_params = [{transform_indices = @transform_0, window_bounds = array<i64: 256, 64>}, {pipeline_mode = #tpu.pipeline_mode<synchronous>, transform_indices = @transform_1, window_bounds = array<i64: 64, 128>}, {pipeline_mode = #tpu.pipeline_mode<synchronous>, transform_indices = @transform_2, window_bounds = array<i64: 1, 128>}, {transform_indices = @transform_3, window_bounds = array<i64: 256, 128>}]} {
    %c0 = arith.constant 0 : index
    %c0_0 = arith.constant 0 : index
    %0 = vector.load %arg1[%c0, %c0_0] : memref<256x64xf32, #tpu.memory_space<vmem>>, vector<256x64xf32>
    %c0_1 = arith.constant 0 : index
    %c0_2 = arith.constant 0 : index
    %1 = vector.load %arg2[%c0_1, %c0_2] : memref<64x128xf32, #tpu.memory_space<vmem>>, vector<64x128xf32>
    %cst = arith.constant dense<0.000000e+00> : vector<256x128xf32>
    %2 = tpu.matmul %0, %1, %cst {dimension_numbers = #tpu.dot_dimension_numbers<[1], [0], [0], [1], [0, 0, 1, 1], [], []>} : vector<256x64xf32>, vector<64x128xf32>, vector<256x128xf32> -> vector<256x128xf32>
    %c0_3 = arith.constant 0 : index
    %c0_4 = arith.constant 0 : index
    %3 = vector.load %arg3[%c0_3, %c0_4] : memref<1x128xf32, #tpu.memory_space<vmem>>, vector<1x128xf32>
    %4 = vector.broadcast %3 : vector<1x128xf32> to vector<256x128xf32>
    %5 = arith.addf %2, %4 : vector<256x128xf32>
    %6 = tpu.iota {dimensions = array<i32: 1>} : vector<256x128xi32>
    %c64_i32 = arith.constant 64 : i32
    %c0_i32 = arith.constant 0 : i32
    %7 = arith.cmpi eq, %c64_i32, %c0_i32 : i32
    %c1_i32 = arith.constant 1 : i32
    %8 = arith.select %7, %c1_i32, %c64_i32 : i32
    %9 = vector.broadcast %8 : i32 to vector<256x128xi32>
    %10 = arith.remsi %6, %9 : vector<256x128xi32>
    %c0_i32_5 = arith.constant 0 : i32
    %11 = vector.broadcast %c0_i32_5 : i32 to vector<256x128xi32>
    %12 = arith.cmpi ne, %10, %11 : vector<256x128xi32>
    %c0_i32_6 = arith.constant 0 : i32
    %13 = vector.broadcast %c0_i32_6 : i32 to vector<256x128xi32>
    %14 = arith.cmpi slt, %10, %13 : vector<256x128xi32>
    %c0_i32_7 = arith.constant 0 : i32
    %15 = arith.cmpi slt, %8, %c0_i32_7 : i32
    %16 = vector.broadcast %15 : i1 to vector<256x128xi1>
    %17 = vector.broadcast %16 : vector<256x128xi1> to vector<256x128xi1>
    %18 = arith.xori %14, %17 : vector<256x128xi1>
    %19 = arith.andi %18, %12 : vector<256x128xi1>
    %20 = vector.broadcast %8 : i32 to vector<256x128xi32>
    %21 = arith.addi %10, %20 : vector<256x128xi32>
    %22 = arith.select %19, %21, %10 : vector<256x128xi1>, vector<256x128xi32>
    %c32_i32 = arith.constant 32 : i32
    %23 = vector.broadcast %c32_i32 : i32 to vector<256x128xi32>
    %24 = arith.cmpi slt, %22, %23 : vector<256x128xi32>
    %25 = math.tanh %5 : vector<256x128xf32>
    %cst_8 = arith.constant 5.000000e-01 : f32
    %26 = vector.broadcast %cst_8 : f32 to vector<256x128xf32>
    %27 = arith.subf %26, %5 : vector<256x128xf32>
    %cst_9 = arith.constant 0.000000e+00 : f32
    %28 = vector.broadcast %cst_9 : f32 to vector<256x128xf32>
    %29 = arith.maximumf %27, %28 : vector<256x128xf32>
    %30 = vector.broadcast %cst_9 : f32 to vector<256x128xf32>
    %31 = arith.subf %27, %30 : vector<256x128xf32>
    %32 = arith.cmpf one, %31, %31 : vector<256x128xf32>
    %33 = vector.broadcast %cst_9 : f32 to vector<256x128xf32>
    %34 = arith.addf %27, %33 : vector<256x128xf32>
    %35 = math.absf %31 : vector<256x128xf32>
    %cst_10 = arith.constant 0.000000e+00 : f32
    %36 = vector.broadcast %cst_10 : f32 to vector<256x128xf32>
    %37 = arith.subf %36, %35 : vector<256x128xf32>
    %38 = math.exp %37 : vector<256x128xf32>
    %39 = math.log1p %38 : vector<256x128xf32>
    %40 = arith.addf %29, %39 : vector<256x128xf32>
    %41 = arith.select %32, %34, %40 : vector<256x128xi1>, vector<256x128xf32>
    %cst_11 = arith.constant 5.000000e-01 : f32
    %42 = vector.broadcast %cst_11 : f32 to vector<256x128xf32>
    %43 = arith.subf %42, %41 : vector<256x128xf32>
    %cst_12 = arith.constant -1.000000e+01 : f32
    %44 = vector.broadcast %cst_12 : f32 to vector<256x128xf32>
    %45 = arith.subf %43, %44 : vector<256x128xf32>
    %cst_13 = arith.constant 0.000000e+00 : f32
    %46 = vector.broadcast %cst_13 : f32 to vector<256x128xf32>
    %47 = arith.maximumf %45, %46 : vector<256x128xf32>
    %48 = vector.broadcast %cst_13 : f32 to vector<256x128xf32>
    %49 = arith.subf %45, %48 : vector<256x128xf32>
    %50 = arith.cmpf one, %49, %49 : vector<256x128xf32>
    %51 = vector.broadcast %cst_13 : f32 to vector<256x128xf32>
    %52 = arith.addf %45, %51 : vector<256x128xf32>
    %53 = math.absf %49 : vector<256x128xf32>
    %cst_14 = arith.constant 0.000000e+00 : f32
    %54 = vector.broadcast %cst_14 : f32 to vector<256x128xf32>
    %55 = arith.subf %54, %53 : vector<256x128xf32>
    %56 = math.exp %55 : vector<256x128xf32>
    %57 = math.log1p %56 : vector<256x128xf32>
    %58 = arith.addf %47, %57 : vector<256x128xf32>
    %59 = arith.select %50, %52, %58 : vector<256x128xi1>, vector<256x128xf32>
    %cst_15 = arith.constant -1.000000e+01 : f32
    %60 = vector.broadcast %cst_15 : f32 to vector<256x128xf32>
    %61 = arith.addf %60, %59 : vector<256x128xf32>
    %62 = arith.select %24, %25, %61 : vector<256x128xi1>, vector<256x128xf32>
    %c0_16 = arith.constant 0 : index
    %c0_17 = arith.constant 0 : index
    %63 = vector.load %arg4[%c0_16, %c0_17] : memref<256x128xf32, #tpu.memory_space<vmem>>, vector<256x128xf32>
    tpu.vector_store %arg4[%c0_16, %c0_17], %62 {strides = array<i32>} : memref<256x128xf32, #tpu.memory_space<vmem>>, vector<256x128xf32>,
    return
  }
  func.func @transform_0(%arg0: i32) -> (i32, i32) {
    %c0_i32 = arith.constant 0 : i32
    %c0_i32_0 = arith.constant 0 : i32
    return %arg0, %c0_i32 : i32, i32
  }
  func.func @transform_1(%arg0: i32) -> (i32, i32) {
    %c0_i32 = arith.constant 0 : i32
    %c0_i32_0 = arith.constant 0 : i32
    %c0_i32_1 = arith.constant 0 : i32
    return %c0_i32, %c0_i32_0 : i32, i32
  }
  func.func @transform_2(%arg0: i32) -> (i32, i32) {
    %c0_i32 = arith.constant 0 : i32
    %c0_i32_0 = arith.constant 0 : i32
    %c0_i32_1 = arith.constant 0 : i32
    return %c0_i32, %c0_i32_0 : i32, i32
  }
  func.func @transform_3(%arg0: i32) -> (i32, i32) {
    %c0_i32 = arith.constant 0 : i32
    %c0_i32_0 = arith.constant 0 : i32
    return %arg0, %c0_i32 : i32, i32
  }
}

</mosaic_0001>

<bundles_post_ra>
// kernel: tpu_custom_call.1
= control target key start
LH: loop header
LB: loop body
LE: loop exit
PB: predicated region body
PF: predicated region fallthrough
CT: control target
= control target key end

     0   :  { %s3926_s0 = inlined_call_operand.vmem [shape: f32[256,64], index: 0, kind: input, shape index: {}]   ;;  %s3927_s1 = inlined_call_operand.vmem [shape: f32[64,128], index: 1, kind: input, shape index: {}]   ;;  %s3928_s2 = inlined_call_operand.vmem [shape: f32[1,128], index: 2, kind: input, shape index: {}]   ;;  %s3929_s3 = inlined_call_operand.hbm [shape: f32[256,128], index: 3, kind: output, shape index: {}]  }
   0x1   :  { %v54_v0 = vld [vmem:[%s3927_s1 + $0x38] sm:$0xff]  ;;  %v53_v1 = vld [vmem:[%s3927_s1 + $0x30] sm:$0xff]  ;;  %v52_v2 = vld [vmem:[%s3927_s1 + $0x28] sm:$0xff] }
   0x2   :  { %1896 = vmatprep.subr.mxu0 %v54_v0  ;;  %1960 = vmatprep.subr.mxu1 %v54_v0  ;;  %v51_v3 = vld [vmem:[%s3927_s1 + $0x20] sm:$0xff]  ;;  %v50_v4 = vld [vmem:[%s3927_s1 + $0x18] sm:$0xff]  ;;  %v49_v5 = vld [vmem:[%s3927_s1 + $0x10] sm:$0xff] }
   0x3   :  { %1897 = vmatpush3.msra.mxu0 %v54_v0  ;;  %1968 = vmatpush3.msra.mxu1 %v54_v0  ;;  %v48_v6 = vld [vmem:[%s3927_s1 + $0x8] sm:$0xff]  ;;  %v47_v7 = vld [vmem:[%s3927_s1] sm:$0xff] }
   0x4   :  { %1898 = vmatprep.subr.mxu0 %v53_v1  ;;  %1961 = vmatprep.subr.mxu1 %v53_v1 }
   0x5   :  { %1899 = vmatpush3.msra.mxu0 %v53_v1  ;;  %1969 = vmatpush3.msra.mxu1 %v53_v1 }
   0x6   :  { %1900 = vmatprep.subr.mxu0 %v52_v2  ;;  %1962 = vmatprep.subr.mxu1 %v52_v2 }
   0x7   :  { %1901 = vmatpush3.msra.mxu0 %v52_v2  ;;  %1970 = vmatpush3.msra.mxu1 %v52_v2 }
   0x8   :  { %1902 = vmatprep.subr.mxu0 %v51_v3  ;;  %1963 = vmatprep.subr.mxu1 %v51_v3 }
   0x9   :  { %1903 = vmatpush3.msra.mxu0 %v51_v3  ;;  %1971 = vmatpush3.msra.mxu1 %v51_v3 }
   0xa   :  { %1904 = vmatprep.subr.mxu0 %v50_v4  ;;  %1964 = vmatprep.subr.mxu1 %v50_v4 }
   0xb   :  { %1905 = vmatpush3.msra.mxu0 %v50_v4  ;;  %1972 = vmatpush3.msra.mxu1 %v50_v4 }
   0xc   :  { %1906 = vmatprep.subr.mxu0 %v49_v5  ;;  %1965 = vmatprep.subr.mxu1 %v49_v5 }
   0xd   :  { %1907 = vmatpush3.msra.mxu0 %v49_v5  ;;  %1973 = vmatpush3.msra.mxu1 %v49_v5 }
   0xe   :  { %1908 = vmatprep.subr.mxu0 %v48_v6  ;;  %1966 = vmatprep.subr.mxu1 %v48_v6 }
   0xf   :  { %8 = vsyncpa [#allocation3], 0  ;;  %1909 = vmatpush3.msra.mxu0 %v48_v6  ;;  %1974 = vmatpush3.msra.mxu1 %v48_v6  ;;  %v15_v8 = vld [vmem:[%s3926_s0] sm:$0xff]  ;;  %vm62_vm0 = vcmask 523264   ;;  %v16_v10 = vld [vmem:[%s3926_s0 + $0x8] sm:$0xff] }
  0x10   :  { %v31_v9 = vld [vmem:[%s3926_s0 + $0x80] sm:$0xff]  ;;  %1910 = vmatprep.subr.mxu0 %v47_v7  ;;  %1967 = vmatprep.subr.mxu1 %v47_v7  ;;  %v32_v11 = vld [vmem:[%s3926_s0 + $0x88] sm:$0xff]  ;;  %v17_v12 = vld [vmem:[%s3926_s0 + $0x10] sm:$0xff] }
  0x11   :  { %1911 = vmatpush3.msra.mxu0 %v47_v7  ;;  %1975 = vmatpush3.msra.mxu1 %v47_v7  ;;  %v33_v13 = vld [vmem:[%s3926_s0 + $0x90] sm:$0xff]  ;;  %v18_v14 = vld [vmem:[%s3926_s0 + $0x18] sm:$0xff]  ;;  %v19_v16 = vld [vmem:[%s3926_s0 + $0x20] sm:$0xff] }
  0x12   :  { %1912 = vmatprep.mubr.msk.f32.mxu0 %vm62_vm0, %v15_v8  ;;  %1936 = vmatprep.mubr.msk.f32.mxu1 %vm62_vm0, %v31_v9  ;;  %v34_v15 = vld [vmem:[%s3926_s0 + $0x98] sm:$0xff]  ;;  %v35_v17 = vld [vmem:[%s3926_s0 + $0xa0] sm:$0xff]  ;;  %v20_v18 = vld [vmem:[%s3926_s0 + $0x28] sm:$0xff] }
  0x13   :  { %1913 = vmatmul.mubr.msk.f32.vlgmr.msra.gmra.mxu0 %vm62_vm0, %v16_v10  ;;  %1937 = vmatmul.mubr.msk.f32.vlgmr.msra.gmra.mxu1 %vm62_vm0, %v32_v11  ;;  %v36_v19 = vld [vmem:[%s3926_s0 + $0xa8] sm:$0xff]  ;;  %v21_v20 = vld [vmem:[%s3926_s0 + $0x30] sm:$0xff]  ;;  %v22_v22 = vld [vmem:[%s3926_s0 + $0x38] sm:$0xff] }
  0x14   :  { %1915 = vmatprep.mubr.msk.f32.mxu0 %vm62_vm0, %v17_v12  ;;  %1939 = vmatprep.mubr.msk.f32.mxu1 %vm62_vm0, %v33_v13  ;;  %v37_v21 = vld [vmem:[%s3926_s0 + $0xb0] sm:$0xff]  ;;  %v38_v23 = vld [vmem:[%s3926_s0 + $0xb8] sm:$0xff]  ;;  %v23_v24 = vld [vmem:[%s3926_s0 + $0x40] sm:$0xff] }
  0x15   :  { %v39_v25 = vld [vmem:[%s3926_s0 + $0xc0] sm:$0xff]  ;;  %v24_v26 = vld [vmem:[%s3926_s0 + $0x48] sm:$0xff]  ;;  %v25_v28 = vld [vmem:[%s3926_s0 + $0x50] sm:$0xff] }
  0x16   :  { %v40_v27 = vld [vmem:[%s3926_s0 + $0xc8] sm:$0xff]  ;;  %v41_v29 = vld [vmem:[%s3926_s0 + $0xd0] sm:$0xff]  ;;  %v26_v30 = vld [vmem:[%s3926_s0 + $0x58] sm:$0xff] }
  0x17   :  { %1916 = vmatmul.mubr.msk.f32.gmra.mxu0 %vm62_vm0, %v18_v14  ;;  %1940 = vmatmul.mubr.msk.f32.gmra.mxu1 %vm62_vm0, %v34_v15  ;;  %v42_v31 = vld [vmem:[%s3926_s0 + $0xd8] sm:$0xff]  ;;  %v27_v32 = vld [vmem:[%s3926_s0 + $0x60] sm:$0xff]  ;;  %v28_v34 = vld [vmem:[%s3926_s0 + $0x68] sm:$0xff] }
  0x18   :  { %1918 = vmatprep.mubr.msk.f32.mxu0 %vm62_vm0, %v19_v16  ;;  %1942 = vmatprep.mubr.msk.f32.mxu1 %vm62_vm0, %v35_v17  ;;  %v43_v33 = vld [vmem:[%s3926_s0 + $0xe0] sm:$0xff]  ;;  %v44_v35 = vld [vmem:[%s3926_s0 + $0xe8] sm:$0xff]  ;;  %v29_v36 = vld [vmem:[%s3926_s0 + $0x70] sm:$0xff] }
  0x19   :  { %v45_v37 = vld [vmem:[%s3926_s0 + $0xf0] sm:$0xff]  ;;  %v30_v38 = vld [vmem:[%s3926_s0 + $0x78] sm:$0xff]  ;;  %v2501_v40 = vld [vmem:[%s3928_s2] ss:$0 sm:$0xff] }
  0x1a   :  { %v46_v39 = vld [vmem:[%s3926_s0 + $0xf8] sm:$0xff] }
  0x1b   :  { %1919 = vmatmul.mubr.msk.f32.gmra.mxu0 %vm62_vm0, %v20_v18  ;;  %1943 = vmatmul.mubr.msk.f32.gmra.mxu1 %vm62_vm0, %v36_v19 }
  0x1c   :  { %1921 = vmatprep.mubr.msk.f32.mxu0 %vm62_vm0, %v21_v20  ;;  %1945 = vmatprep.mubr.msk.f32.mxu1 %vm62_vm0, %v37_v21 }
  0x1f   :  { %1922 = vmatmul.mubr.msk.f32.gmra.mxu0 %vm62_vm0, %v22_v22  ;;  %1946 = vmatmul.mubr.msk.f32.gmra.mxu1 %vm62_vm0, %v38_v23 }
  0x20   :  { %1924 = vmatprep.mubr.msk.f32.mxu0 %vm62_vm0, %v23_v24  ;;  %1948 = vmatprep.mubr.msk.f32.mxu1 %vm62_vm0, %v39_v25 }
  0x23   :  { %1925 = vmatmul.mubr.msk.f32.gmra.mxu0 %vm62_vm0, %v24_v26  ;;  %1949 = vmatmul.mubr.msk.f32.gmra.mxu1 %vm62_vm0, %v40_v27 }
  0x24   :  { %1927 = vmatprep.mubr.msk.f32.mxu0 %vm62_vm0, %v25_v28  ;;  %1951 = vmatprep.mubr.msk.f32.mxu1 %vm62_vm0, %v41_v29 }
  0x27   :  { %1928 = vmatmul.mubr.msk.f32.gmra.mxu0 %vm62_vm0, %v26_v30  ;;  %1952 = vmatmul.mubr.msk.f32.gmra.mxu1 %vm62_vm0, %v42_v31 }
  0x28   :  { %1930 = vmatprep.mubr.msk.f32.mxu0 %vm62_vm0, %v27_v32  ;;  %1954 = vmatprep.mubr.msk.f32.mxu1 %vm62_vm0, %v43_v33 }
  0x2b   :  { %1931 = vmatmul.mubr.msk.f32.gmra.mxu0 %vm62_vm0, %v28_v34  ;;  %1955 = vmatmul.mubr.msk.f32.gmra.mxu1 %vm62_vm0, %v44_v35 }
  0x2c   :  { %1933 = vmatprep.mubr.msk.f32.mxu0 %vm62_vm0, %v29_v36  ;;  %1957 = vmatprep.mubr.msk.f32.mxu1 %vm62_vm0, %v45_v37 }
  0x2f   :  { %1934 = vmatmul.mubr.msk.f32.gmra.mxu0 %vm62_vm0, %v30_v38  ;;  %1958 = vmatmul.mubr.msk.f32.gmra.mxu1 %vm62_vm0, %v46_v39 }
  0xd3   :  { %v1914_v41 = vpop.f32.mrf.mxu0  ;;  %v1938_v42 = vpop.f32.mrf.mxu1 }
  0xd4   :  { %v231_v43 = vadd.f32 %v1914_v41, %v2501_v40  ;;  %v311_v44 = vadd.f32 %v1938_v42, %v2501_v40 }
  0xd5   :  { %v225_v45 = vpop.f32.mrf.mxu0  ;;  %v305_v46 = vpop.f32.mrf.mxu1 }
  0xd6   :  { %v2505_v47 = vsub.f32 0.5, %v231_v43  ;;  %v2507_v48 = vsub.f32 0.5, %v311_v44  ;;  %v226_v49 = vadd.f32 %v2501_v40, %v225_v45  ;;  %v306_v50 = vadd.f32 %v2501_v40, %v305_v46 }
  0xd7   :  { %v1917_v51 = vpop.f32.mrf.mxu0  ;;  %v1941_v58 = vpop.f32.mrf.mxu1 }
  0xd8   :  { %v560_v52 = vand.u32 2147483647, %v2505_v47  ;;  %v576_v53 = vand.u32 2147483647, %v2507_v48  ;;  %v2513_v54 = vsub.f32 0.5, %v226_v49  ;;  %v2515_v56 = vsub.f32 0.5, %v306_v50 }
  0xd9   :  { %v241_v57 = vadd.f32 %v1917_v51, %v2501_v40  ;;  %v235_v59 = vpop.f32.mrf.mxu0  ;;  %v321_v4 = vadd.f32 %v1941_v58, %v2501_v40  ;;  %v315_v6 = vpop.f32.mrf.mxu1  ;;  %v464_v45 = vmax.f32 %v2505_v47, 0.0  ;;  %vm496_vm1 = vcmp.ne.f32.partialorder %v2505_v47, %v2505_v47 }
  0xda   :  { %v592_v55 = vsub.f32 0.0, %v560_v52  ;;  %v608_v60 = vsub.f32 0.0, %v576_v53  ;;  %v559_v61 = vand.u32 2147483647, %v2513_v54  ;;  %v575_v63 = vand.u32 2147483647, %v2515_v56 }
  0xdb   :  { %v2520_v2 = vsub.f32 0.5, %v241_v57  ;;  %v2524_v5 = vadd.f32 %v2501_v40, %v235_v59  ;;  %v1920_v7 = vpop.f32.mrf.mxu0  ;;  %v2527_v11 = vsub.f32 0.5, %v321_v4  ;;  %v2533_v13 = vadd.f32 %v2501_v40, %v315_v6  ;;  %v1944_v20 = vpop.f32.mrf.mxu1 }
  0xdc   :  { %v625_v62 = vmul.f32 1.442695, %v592_v55  ;;  %v657_v0 = vmul.f32 1.442695, %v608_v60  ;;  %v591_v1 = vsub.f32 0.0, %v559_v61  ;;  %v607_v3 = vsub.f32 0.0, %v575_v63 }
  0xdd   :  { %v562_v10 = vand.u32 2147483647, %v2520_v2  ;;  %v2530_v12 = vsub.f32 0.5, %v2524_v5  ;;  %v2536_v14 = vadd.f32 %v1920_v7, %v2501_v40  ;;  %v578_v16 = vand.u32 2147483647, %v2527_v11  ;;  %v245_v38 = vpop.f32.mrf.mxu0 }
  0xde   :  { %1979 = vpow2.f32 %v625_v62  ;;  %v623_v8 = vmul.f32 1.442695, %v591_v1  ;;  %v655_v9 = vmul.f32 1.442695, %v607_v3  ;;  %v2541_v19 = vsub.f32 0.5, %v2533_v13 }
  0xdf   :  { %1981 = vpow2.f32 %v657_v0  ;;  %v594_v15 = vsub.f32 0.0, %v562_v10  ;;  %v561_v18 = vand.u32 2147483647, %v2530_v12  ;;  %v610_v21 = vsub.f32 0.0, %v578_v16 }
  0xe0   :  { %1983 = vpow2.f32 %v623_v8  ;;  %v2544_v22 = vsub.f32 0.5, %v2536_v14  ;;  %v577_v25 = vand.u32 2147483647, %v2541_v19  ;;  %v2548_v26 = vadd.f32 %v1944_v20, %v2501_v40 }
  0xe1   :  { %1985 = vpow2.f32 %v655_v9  ;;  %v629_v17 = vmul.f32 1.442695, %v594_v15  ;;  %v593_v23 = vsub.f32 0.0, %v561_v18  ;;  %v661_v24 = vmul.f32 1.442695, %v610_v21  ;;  %v325_v9 = vpop.f32.mrf.mxu1 }
  0xe2   :  { %1987 = vtanh.f32 %v231_v43  ;;  %v564_v28 = vand.u32 2147483647, %v2544_v22  ;;  %v609_v29 = vsub.f32 0.0, %v577_v25  ;;  %v2554_v33 = vsub.f32 0.5, %v2548_v26 }
  0xe3   :  { %1989 = vpow2.f32 %v629_v17  ;;  %v627_v27 = vmul.f32 1.442695, %v593_v23  ;;  %v2571_v51 = vadd.f32 %v2501_v40, %v245_v38  ;;  %v466_v59 = vmax.f32 %v2520_v2, 0.0 }
  0xe4   :  { %1991 = vtanh.f32 %v311_v44  ;;  %v659_v31 = vmul.f32 1.442695, %v609_v29  ;;  %v596_v32 = vsub.f32 0.0, %v564_v28  ;;  %v580_v43 = vand.u32 2147483647, %v2554_v33 }
  0xe5   :  { %1993 = vtanh.f32 %v226_v49  ;;  %v384_v44 = vlaneseq  ;;  %v480_v49 = vmax.f32 %v2507_v48, 0.0  ;;  %v482_v60 = vmax.f32 %v2527_v11, 0.0 }
  0xe6   :  { %1995 = vpow2.f32 %v661_v24  ;;  %v633_v42 = vmul.f32 1.442695, %v596_v32  ;;  %v612_v61 = vsub.f32 0.0, %v580_v43  ;;  %v465_v1 = vmax.f32 %v2530_v12, 0.0 }
  0xe7   :  { %1997 = vpow2.f32 %v627_v27  ;;  %v2594_v8 = vsub.f32 0.5, %v2571_v51  ;;  %v481_v21 = vmax.f32 %v2541_v19, 0.0  ;;  %v2615_v29 = vadd.f32 %v2501_v40, %v325_v9 }
  0xe8   :  { %1999 = vtanh.f32 %v306_v50  ;;  %v463_v50 = vmax.f32 %v2513_v54, 0.0  ;;  %v665_v23 = vmul.f32 1.442695, %v612_v61  ;;  %vm512_vm3 = vcmp.ne.f32.partialorder %v2507_v48, %v2507_v48 }
  0xe9   :  { %2001 = vtanh.f32 %v241_v57  ;;  %v479_v57 = vmax.f32 %v2515_v56, 0.0  ;;  %vm495_vm5 = vcmp.ne.f32.partialorder %v2513_v54, %v2513_v54  ;;  %vm511_vm7 = vcmp.ne.f32.partialorder %v2515_v56, %v2515_v56 }
  0xea   :  { %2003 = vpow2.f32 %v659_v31  ;;  %vm498_vm11 = vcmp.ne.f32.partialorder %v2520_v2, %v2520_v2  ;;  %vm514_vm12 = vcmp.ne.f32.partialorder %v2527_v11, %v2527_v11  ;;  %vm497_vm14 = vcmp.ne.f32.partialorder %v2530_v12, %v2530_v12 }
  0xeb   :  { %v2551_v30 = vpop.eup %1979  ;;  %vm513_vm0 = vcmp.ne.f32.partialorder %v2541_v19, %v2541_v19 }
  0xec   :  { %v2556_v34 = vpop.eup %1981  ;;  %v696_v35 = vadd.f32 1.0, %v2551_v30  ;;  %v699_v53 = vmul.f32 -0.5, %v2551_v30  ;;  %v702_v63 = vand.u32 2147483647, %v2551_v30 }
  0xed   :  { %v840_v36 = vadd.f32 1.0, %v2556_v34  ;;  %v2560_v37 = vpop.eup %1983  ;;  %v843_v55 = vmul.f32 -0.5, %v2556_v34 }
  0xee   :  { %2005 = vlog2.f32 %v696_v35  ;;  %v2562_v39 = vpop.eup %1985  ;;  %v687_v41 = vadd.f32 1.0, %v2560_v37  ;;  %v690_v6 = vmul.f32 -0.5, %v2560_v37  ;;  %v700_v15 = vadd.f32 1.0, %v699_v53 }
  0xef   :  { %2007 = vlog2.f32 %v840_v36  ;;  %v831_v46 = vadd.f32 1.0, %v2562_v39  ;;  %v2573_v52 = vpop.eup %1987  ;;  %v834_v7 = vmul.f32 -0.5, %v2562_v39  ;;  %v844_v16 = vadd.f32 1.0, %v843_v55 }
  0xf0   :  { %2009 = vtanh.f32 %v321_v4  ;;  %v2578_v58 = vpop.eup %1989  ;;  %v846_v4 = vand.u32 2147483647, %v2556_v34  ;;  %v693_v18 = vand.u32 2147483647, %v2560_v37  ;;  %vm2608_vm2 = vcmp.lt.f32.partialorder %v702_v63, 0.0004427343 }
  0xf1   :  { %2011 = vlog2.f32 %v687_v41  ;;  %v2582_v62 = vpop.eup %1991  ;;  %v714_v0 = vadd.f32 1.0, %v2578_v58  ;;  %v837_v27 = vand.u32 2147483647, %v2562_v39  ;;  %v691_v35 = vadd.f32 1.0, %v690_v6 }
  0xf2   :  { %2013 = vlog2.f32 %v831_v46  ;;  %v2588_v3 = vpop.eup %1993  ;;  %vm2621_vm4 = vcmp.lt.f32.partialorder %v846_v4, 0.0004427343  ;;  %v835_v36 = vadd.f32 1.0, %v834_v7  ;;  %v701_v41 = vmul.f32 %v2551_v30, %v700_v15 }
  0xf3   :  { %2015 = vpow2.f32 %v633_v42  ;;  %v2596_v10 = vpop.eup %1995  ;;  %v845_v42 = vmul.f32 %v2556_v34, %v844_v16  ;;  %v563_v46 = vand.u32 2147483647, %v2594_v8  ;;  %vm2632_vm6 = vcmp.lt.f32.partialorder %v693_v18, 0.0004427343 }
  0xf4   :  { %2017 = vtanh.f32 %v2524_v5  ;;  %v717_v5 = vmul.f32 -0.5, %v2578_v58  ;;  %v2599_v17 = vpop.eup %1997  ;;  %v858_v20 = vadd.f32 1.0, %v2596_v10  ;;  %v720_v61 = vand.u32 2147483647, %v2578_v58 }
  0xf5   :  { %2019 = vlog2.f32 %v714_v0  ;;  %v2604_v24 = vpop.eup %1999  ;;  %v705_v28 = vadd.f32 1.0, %v2599_v17  ;;  %vm2640_vm8 = vcmp.lt.f32.partialorder %v837_v27, 0.0004427343  ;;  %v861_v4 = vmul.f32 -0.5, %v2596_v10 }
  0xf6   :  { %v2617_v31 = vpop.eup %2001  ;;  %2021 = vlog2.f32 %v858_v20  ;;  %v718_v43 = vadd.f32 1.0, %v717_v5  ;;  %v692_v9 = vmul.f32 %v2560_v37, %v691_v35  ;;  %v836_v15 = vmul.f32 %v2562_v39, %v835_v36 }
  0xf7   :  { %v2625_v38 = vpop.eup %2003  ;;  %2023 = vpow2.f32 %v665_v23  ;;  %v864_v20 = vand.u32 2147483647, %v2596_v10  ;;  %v2655_v23 = vsub.f32 0.0, %v563_v46  ;;  %vm2661_vm9 = vcmp.lt.f32.partialorder %v720_v61, 0.0004427343 }
  0xf8   :  { %v849_v63 = vadd.f32 1.0, %v2625_v38  ;;  %2025 = vlog2.f32 %v705_v28  ;;  %v2652_v18 = vmul.f32 %v2578_v58, %v718_v43  ;;  %v708_v25 = vmul.f32 -0.5, %v2599_v17 }
  0xf9   :  { %v862_v43 = vadd.f32 1.0, %v861_v4  ;;  %v711_v46 = vand.u32 2147483647, %v2599_v17  ;;  %vm2689_vm10 = vcmp.lt.f32.partialorder %v864_v20, 0.0004427343 }
  0xfa   :  { %2027 = vlog2.f32 %v849_v63  ;;  %v855_v34 = vand.u32 2147483647, %v2625_v38 }
  0xfb   :  { %v2006_v53 = vpop.eup %2005  ;;  %vm2714_vm13 = vcmp.lt.f32.partialorder %v711_v46, 0.0004427343 }
  0xfc   :  { %v2008_v0 = vpop.eup %2007  ;;  %v698_v30 = vmul.f32 0.6931472, %v2006_v53  ;;  %v852_v53 = vmul.f32 -0.5, %v2625_v38  ;;  %vm2733_vm15 = vcmp.lt.f32.partialorder %v855_v34, 0.0004427343 }
  0xfd   :  { %v2645_v6 = vpop.eup %2009  ;;  %v842_v7 = vmul.f32 0.6931472, %v2008_v0 }
  0xfe   :  { %v2012_v16 = vpop.eup %2011  ;;  %v704_v5 = vsel %vm2608_vm2, %v701_v41, %v698_v30  ;;  %vm500_vm2 = vcmp.ne.f32.partialorder %v2544_v22, %v2544_v22 }
  0xff   :  { %v2014_v27 = vpop.eup %2013  ;;  %v976_v28 = vadd.f32 %v704_v5, %v464_v45  ;;  %v848_v37 = vsel %vm2621_vm4, %v845_v42, %v842_v7  ;;  %v689_v39 = vmul.f32 0.6931472, %v2012_v16 }
 0x100   :  { %v2666_v58 = vpop.eup %2015  ;;  %v992_v36 = vadd.f32 %v848_v37, %v480_v49  ;;  %v833_v41 = vmul.f32 0.6931472, %v2014_v27 }
 0x101   :  { %v2671_v45 = vpop.eup %2017  ;;  %v1008_v32 = vsel %vm496_vm1, %v2505_v47, %v976_v28  ;;  %v695_v42 = vsel %vm2632_vm6, %v692_v9, %v689_v39  ;;  %v732_v61 = vadd.f32 1.0, %v2666_v58  ;;  %v709_v9 = vadd.f32 1.0, %v708_v25 }
 0x102   :  { %v1040_v63 = vsub.f32 0.5, %v1008_v32  ;;  %v1024_v49 = vsel %vm512_vm3, %v2507_v48, %v992_v36  ;;  %v975_v0 = vadd.f32 %v695_v42, %v463_v50  ;;  %v839_v30 = vsel %vm2640_vm8, %v836_v15, %v833_v41  ;;  %v2020_v55 = vpop.eup %2019 }
 0x103   :  { %v1056_v4 = vsub.f32 0.5, %v1024_v49  ;;  %v991_v7 = vadd.f32 %v839_v30, %v479_v57  ;;  %2029 = vlog2.f32 %v732_v61  ;;  %v716_v50 = vmul.f32 0.6931472, %v2020_v55 }
 0x104   :  { %v2695_v16 = vadd.f32 10.0, %v1040_v63  ;;  %v1007_v48 = vsel %vm495_vm5, %v2513_v54, %v975_v0  ;;  %v735_v20 = vmul.f32 -0.5, %v2666_v58  ;;  %v2022_v54 = vpop.eup %2021  ;;  %v853_v39 = vadd.f32 1.0, %v852_v53 }
 0x105   :  { %v2704_v15 = vadd.f32 10.0, %v1056_v4  ;;  %v1039_v5 = vsub.f32 0.5, %v1007_v48  ;;  %v1023_v57 = vsel %vm511_vm7, %v2515_v56, %v991_v7  ;;  %v863_v56 = vmul.f32 %v2596_v10, %v862_v43  ;;  %v2723_v32 = vpop.eup %2023 }
 0x106   :  { %v1200_v27 = vand.u32 2147483647, %v2695_v16  ;;  %v1055_v28 = vsub.f32 0.5, %v1023_v57  ;;  %v710_v41 = vmul.f32 %v2599_v17, %v709_v9  ;;  %v722_v46 = vsel %vm2661_vm9, %v2652_v18, %v716_v50  ;;  %v2026_v53 = vpop.eup %2025 }
 0x107   :  { %v1216_v25 = vand.u32 2147483647, %v2704_v15  ;;  %v2719_v36 = vadd.f32 10.0, %v1039_v5  ;;  %v860_v63 = vmul.f32 0.6931472, %v2022_v54  ;;  %v736_v17 = vadd.f32 1.0, %v735_v20  ;;  %v2028_v43 = vpop.eup %2027 }
 0x108   :  { %v1232_v42 = vsub.f32 0.0, %v1200_v27  ;;  %v2725_v61 = vadd.f32 10.0, %v1055_v28  ;;  %v854_v18 = vmul.f32 %v2625_v38, %v853_v39  ;;  %v738_v35 = vand.u32 2147483647, %v2666_v58 }
 0x109   :  { %v1248_v49 = vsub.f32 0.0, %v1216_v25  ;;  %v1199_v0 = vand.u32 2147483647, %v2719_v36  ;;  %v978_v9 = vadd.f32 %v722_v46, %v466_v59  ;;  %v866_v48 = vsel %vm2689_vm10, %v863_v56, %v860_v63 }
 0x10a   :  { %v1265_v30 = vmul.f32 1.442695, %v1232_v42  ;;  %v1215_v55 = vand.u32 2147483647, %v2725_v61  ;;  %v994_v34 = vadd.f32 %v866_v48, %v482_v60  ;;  %v707_v5 = vmul.f32 0.6931472, %v2026_v53 }
 0x10b   :  { %v1297_v4 = vmul.f32 1.442695, %v1248_v49  ;;  %v1231_v7 = vsub.f32 0.0, %v1199_v0  ;;  %v1010_v38 = vsel %vm498_vm11, %v2520_v2, %v978_v9  ;;  %v851_v20 = vmul.f32 0.6931472, %v2028_v43  ;;  %v1923_v9 = vpop.f32.mrf.mxu0 }
 0x10c   :  { %2031 = vpow2.f32 %v1265_v30  ;;  %v1247_v50 = vsub.f32 0.0, %v1215_v55  ;;  %v1042_v27 = vsub.f32 0.5, %v1010_v38  ;;  %v1026_v59 = vsel %vm514_vm12, %v2527_v11, %v994_v34 }
 0x10d   :  { %2033 = vpow2.f32 %v1297_v4  ;;  %v1263_v57 = vmul.f32 1.442695, %v1231_v7  ;;  %v713_v47 = vsel %vm2714_vm13, %v710_v41, %v707_v5  ;;  %v1058_v60 = vsub.f32 0.5, %v1026_v59 }
 0x10e   :  { %v1295_v54 = vmul.f32 1.442695, %v1247_v50  ;;  %v977_v28 = vadd.f32 %v713_v47, %v465_v1  ;;  %v857_v39 = vsel %vm2733_vm15, %v854_v18, %v851_v20  ;;  %v2762_v25 = vadd.f32 10.0, %v1042_v27 }
 0x10f   :  { %2035 = vpow2.f32 %v1263_v57  ;;  %v993_v56 = vadd.f32 %v857_v39, %v481_v21  ;;  %v468_v11 = vmax.f32 %v2544_v22, 0.0  ;;  %v2767_v42 = vadd.f32 10.0, %v1058_v60 }
 0x110   :  { %v2030_v2 = vpop.eup %2029  ;;  %2037 = vpow2.f32 %v1295_v54  ;;  %v1009_v37 = vsel %vm497_vm14, %v2530_v12, %v977_v28  ;;  %v876_v41 = vadd.f32 1.0, %v2723_v32  ;;  %v1202_v46 = vand.u32 2147483647, %v2762_v25 }
 0x111   :  { %v734_v1 = vmul.f32 0.6931472, %v2030_v2  ;;  %v1041_v63 = vsub.f32 0.5, %v1009_v37  ;;  %v737_v53 = vmul.f32 %v2666_v58, %v736_v17  ;;  %v2777_v49 = vsub.f32 0.5, %v2615_v29 }
 0x112   :  { %v1218_v21 = vand.u32 2147483647, %v2767_v42  ;;  %v1025_v0 = vsel %vm513_vm0, %v2541_v19, %v993_v56  ;;  %vm739_vm1 = vcmp.lt.f32.partialorder %v738_v35, 0.0004427343  ;;  %v631_v12 = vmul.f32 1.442695, %v2655_v23 }
 0x113   :  { %v1234_v10 = vsub.f32 0.0, %v1202_v46  ;;  %v2785_v43 = vadd.f32 10.0, %v1041_v63  ;;  %v1057_v30 = vsub.f32 0.5, %v1025_v0  ;;  %v740_v55 = vsel %vm739_vm1, %v737_v53, %v734_v1 }
 0x114   :  { %v2788_v58 = vand.u32 127, %v384_v44  ;;  %v1250_v17 = vsub.f32 0.0, %v1218_v21  ;;  %v980_v18 = vadd.f32 %v740_v55, %v468_v11  ;;  %2039 = vlog2.f32 %v876_v41 }
 0x115   :  { %v1269_v4 = vmul.f32 1.442695, %v1234_v10  ;;  %v1201_v7 = vand.u32 2147483647, %v2785_v43  ;;  %2041 = vtanh.f32 %v2533_v13  ;;  %v2794_v23 = vadd.f32 10.0, %v1057_v30 }
 0x116   :  { %v1301_v19 = vmul.f32 1.442695, %v1250_v17  ;;  %v1012_v35 = vsel %vm500_vm2, %v2544_v22, %v980_v18  ;;  %2043 = vpow2.f32 %v631_v12  ;;  %v579_v44 = vand.u32 2147483647, %v2777_v49 }
 0x117   :  { %2045 = vpow2.f32 %v1269_v4  ;;  %v390_v50 = vand.u32 63, %v2788_v58  ;;  %v1233_v34 = vsub.f32 0.0, %v1201_v7  ;;  %v1217_v13 = vand.u32 2147483647, %v2794_v23 }
 0x118   :  { %2047 = vpow2.f32 %v1301_v19  ;;  %v1044_v22 = vsub.f32 0.5, %v1012_v35  ;;  %v484_v38 = vmax.f32 %v2554_v33, 0.0  ;;  %v879_v54 = vmul.f32 -0.5, %v2723_v32 }
 0x119   :  { %v2798_v48 = vpop.eup %2031  ;;  %2049 = vtanh.f32 %v2536_v14  ;;  %v467_v27 = vmax.f32 %v2594_v8, 0.0  ;;  %v2811_v59 = vadd.f32 %v1923_v9, %v2501_v40  ;;  %v1104_v60 = vmax.f32 %v2695_v16, 0.0 }
 0x11a   :  { %v2802_v5 = vpop.eup %2033  ;;  %v1336_v57 = vadd.f32 1.0, %v2798_v48  ;;  %v1249_v28 = vsub.f32 0.0, %v1217_v13  ;;  %v611_v39 = vsub.f32 0.0, %v579_v44  ;;  %v1120_v2 = vmax.f32 %v2704_v15, 0.0 }
 0x11b   :  { %v1480_v20 = vadd.f32 1.0, %v2802_v5  ;;  %v1267_v11 = vmul.f32 1.442695, %v1233_v34  ;;  %v1103_v37 = vmax.f32 %v2719_v36, 0.0  ;;  %v1119_v1 = vmax.f32 %v2725_v61, 0.0 }
 0x11c   :  { %v2813_v47 = vpop.eup %2035  ;;  %2051 = vlog2.f32 %v1336_v57  ;;  %v2823_v46 = vadd.f32 10.0, %v1044_v22  ;;  %v1106_v63 = vmax.f32 %v2762_v25, 0.0  ;;  %v880_v53 = vadd.f32 1.0, %v879_v54 }
 0x11d   :  { %v2816_v14 = vpop.eup %2037  ;;  %2053 = vlog2.f32 %v1480_v20  ;;  %v1327_v56 = vadd.f32 1.0, %v2813_v47  ;;  %v882_v21 = vand.u32 2147483647, %v2723_v32  ;;  %v1339_v0 = vmul.f32 -0.5, %v2798_v48 }
 0x11e   :  { %v1471_v41 = vadd.f32 1.0, %v2816_v14  ;;  %v1483_v12 = vmul.f32 -0.5, %v2802_v5  ;;  %v1299_v10 = vmul.f32 1.442695, %v1249_v28  ;;  %v1330_v30 = vmul.f32 -0.5, %v2813_v47 }
 0x11f   :  { %2055 = vlog2.f32 %v1327_v56  ;;  %v1122_v55 = vmax.f32 %v2767_v42, 0.0  ;;  %v1105_v17 = vmax.f32 %v2785_v43, 0.0  ;;  %vm516_vm3 = vcmp.ne.f32.partialorder %v2554_v33, %v2554_v33 }
 0x120   :  { %2057 = vlog2.f32 %v1471_v41  ;;  %v1342_v4 = vand.u32 2147483647, %v2798_v48  ;;  %v1474_v7 = vmul.f32 -0.5, %v2816_v14  ;;  %v1204_v19 = vand.u32 2147483647, %v2823_v46 }
 0x121   :  { %2059 = vpow2.f32 %v1267_v11  ;;  %v2040_v18 = vpop.eup %2039  ;;  %v1486_v44 = vand.u32 2147483647, %v2802_v5  ;;  %v881_v13 = vmul.f32 %v2723_v32, %v880_v53  ;;  %v1340_v22 = vadd.f32 1.0, %v1339_v0 }
 0x122   :  { %2061 = vpow2.f32 %v1299_v10  ;;  %v2837_v35 = vpop.eup %2041  ;;  %v878_v34 = vmul.f32 0.6931472, %v2040_v18  ;;  %v1484_v20 = vadd.f32 1.0, %v1483_v12  ;;  %v1236_v54 = vsub.f32 0.0, %v1204_v19 }
 0x123   :  { %v2842_v57 = vpop.eup %2043  ;;  %vm2844_vm4 = vcmp.lt.f32.partialorder %v882_v21, 0.0004427343  ;;  %v1331_v11 = vadd.f32 1.0, %v1330_v30  ;;  %v1333_v41 = vand.u32 2147483647, %v2813_v47  ;;  %vm1136_vm5 = vcmp.ne.f32.partialorder %v2695_v16, %v2695_v16 }
 0x124   :  { %v2848_v56 = vpop.eup %2045  ;;  %v1477_v10 = vand.u32 2147483647, %v2816_v14  ;;  %v884_v18 = vsel %vm2844_vm4, %v881_v13, %v878_v34  ;;  %vm2858_vm6 = vcmp.lt.f32.partialorder %v1342_v4, 0.0004427343  ;;  %v1475_v21 = vadd.f32 1.0, %v1474_v7 }
 0x125   :  { %v2854_v32 = vpop.eup %2047  ;;  %v1354_v0 = vadd.f32 1.0, %v2848_v56  ;;  %v1273_v12 = vmul.f32 1.442695, %v1236_v54  ;;  %vm2867_vm7 = vcmp.lt.s32.totalorder %v390_v50, 32  ;;  %vm1152_vm8 = vcmp.ne.f32.partialorder %v2704_v15, %v2704_v15 }
 0x126   :  { %v2863_v30 = vpop.eup %2049  ;;  %vm2873_vm9 = vcmp.lt.f32.partialorder %v1486_v44, 0.0004427343  ;;  %v1498_v7 = vadd.f32 1.0, %v2854_v32  ;;  %v996_v34 = vadd.f32 %v884_v18, %v484_v38  ;;  %v723_v13 = vadd.f32 1.0, %v2842_v57 }
 0x127   :  { %v1341_v58 = vmul.f32 %v2798_v48, %v1340_v22  ;;  %v1485_v50 = vmul.f32 %v2802_v5, %v1484_v20  ;;  %2063 = vlog2.f32 %v1354_v0  ;;  %v663_v54 = vmul.f32 1.442695, %v611_v39 }
 0x128   :  { %vm1135_vm10 = vcmp.ne.f32.partialorder %v2719_v36, %v2719_v36  ;;  %v1332_v44 = vmul.f32 %v2813_v47, %v1331_v11  ;;  %vm2886_vm11 = vcmp.lt.f32.partialorder %v1333_v41, 0.0004427343  ;;  %vm2890_vm12 = vcmp.lt.f32.partialorder %v1477_v10, 0.0004427343 }
 0x129   :  { %v2052_v28 = vpop.eup %2051  ;;  %2065 = vlog2.f32 %v1498_v7  ;;  %vm1151_vm13 = vcmp.ne.f32.partialorder %v2725_v61, %v2725_v61  ;;  %v1476_v5 = vmul.f32 %v2816_v14, %v1475_v21  ;;  %v1028_v47 = vsel %vm516_vm3, %v2554_v33, %v996_v34 }
 0x12a   :  { %v2054_v48 = vpop.eup %2053  ;;  %v1338_v22 = vmul.f32 0.6931472, %v2052_v28  ;;  %2067 = vpow2.f32 %v1273_v12  ;;  %v1357_v20 = vmul.f32 -0.5, %v2848_v56  ;;  %v726_v11 = vmul.f32 -0.5, %v2842_v57 }
 0x12b   :  { %v1482_v39 = vmul.f32 0.6931472, %v2054_v48  ;;  %2069 = vlog2.f32 %v723_v13  ;;  %v1360_v18 = vand.u32 2147483647, %v2848_v56  ;;  %v729_v14 = vand.u32 2147483647, %v2842_v57 }
 0x12c   :  { %v2056_v41 = vpop.eup %2055  ;;  %v1344_v10 = vsel %vm2858_vm6, %v1341_v58, %v1338_v22  ;;  %2071 = vpow2.f32 %v663_v54  ;;  %v1060_v7 = vsub.f32 0.5, %v1028_v47  ;;  %v1501_v58 = vmul.f32 -0.5, %v2854_v32 }
 0x12d   :  { %v2058_v21 = vpop.eup %2057  ;;  %v1616_v0 = vadd.f32 %v1344_v10, %v1104_v60  ;;  %v1488_v33 = vsel %vm2873_vm9, %v1485_v50, %v1482_v39  ;;  %v1329_v12 = vmul.f32 0.6931472, %v2056_v41  ;;  %v1504_v28 = vand.u32 2147483647, %v2854_v32 }
 0x12e   :  { %v2911_v34 = vpop.eup %2059  ;;  %v1632_v53 = vadd.f32 %v1488_v33, %v1120_v2  ;;  %v1473_v13 = vmul.f32 0.6931472, %v2058_v21  ;;  %v1358_v50 = vadd.f32 1.0, %v1357_v20  ;;  %v2936_v9 = vadd.f32 10.0, %v1060_v7 }
 0x12f   :  { %v2917_v54 = vpop.eup %2061  ;;  %v1648_v60 = vsel %vm1136_vm5, %v2695_v16, %v1616_v0  ;;  %v1335_v4 = vsel %vm2886_vm11, %v1332_v44, %v1329_v12  ;;  %v1345_v48 = vadd.f32 1.0, %v2911_v34  ;;  %v1947_v44 = vpop.f32.mrf.mxu1  ;;  %vm1138_vm14 = vcmp.ne.f32.partialorder %v2762_v25, %v2762_v25 }
 0x130   :  { %v1680_v22 = vadd.f32 -10.0, %v1648_v60  ;;  %v1664_v2 = vsel %vm1152_vm8, %v2704_v15, %v1632_v53  ;;  %v1615_v47 = vadd.f32 %v1335_v4, %v1103_v37  ;;  %v1479_v39 = vsel %vm2890_vm12, %v1476_v5, %v1473_v13 }
 0x131   :  { %v1696_v41 = vadd.f32 -10.0, %v1664_v2  ;;  %v1631_v16 = vadd.f32 %v1479_v39, %v1119_v1  ;;  %2073 = vlog2.f32 %v1345_v48  ;;  %v1489_v37 = vadd.f32 1.0, %v2917_v54 }
 0x132   :  { %v1712_v20 = vsel %vm2867_vm7, %v2573_v52, %v1680_v22  ;;  %v1647_v15 = vsel %vm1135_vm10, %v2719_v36, %v1615_v47  ;;  %v727_v38 = vadd.f32 1.0, %v726_v11  ;;  %vm1154_vm15 = vcmp.ne.f32.partialorder %v2767_v42, %v2767_v42 }
 0x133   :  { %1744 = vst [vmem:[#allocation2 + $0x8] sm:$0xff] %v1712_v20  ;;  %v1728_v1 = vsel %vm2867_vm7, %v2582_v62, %v1696_v41  ;;  %v1679_v5 = vadd.f32 -10.0, %v1647_v15  ;;  %v1663_v52 = vsel %vm1151_vm13, %v2725_v61, %v1631_v16  ;;  %v1502_v36 = vadd.f32 1.0, %v1501_v58 }
 0x134   :  { %1760 = vst [vmem:[#allocation2 + $0x88] sm:$0xff] %v1728_v1  ;;  %v1695_v10 = vadd.f32 -10.0, %v1663_v52  ;;  %2075 = vlog2.f32 %v1489_v37  ;;  %v2958_v11 = vsub.f32 0.5, %v2811_v59  ;;  %v2961_v21 = vadd.f32 %v1947_v44, %v2501_v40  ;;  %v2064_v62 = vpop.eup %2063 }
 0x135   :  { %v1711_v0 = vsel %vm2867_vm7, %v2588_v3, %v1679_v5  ;;  %vm2966_vm0 = vcmp.lt.f32.partialorder %v1360_v18, 0.0004427343  ;;  %v1348_v33 = vmul.f32 -0.5, %v2911_v34  ;;  %v1220_v12 = vand.u32 2147483647, %v2936_v9 }
 0x136   :  { %v2066_v7 = vpop.eup %2065  ;;  %1743 = vst [vmem:[#allocation2] sm:$0xff] %v1711_v0  ;;  %v1727_v53 = vsel %vm2867_vm7, %v2604_v24, %v1695_v10  ;;  %v1356_v13 = vmul.f32 0.6931472, %v2064_v62  ;;  %v1359_v58 = vmul.f32 %v2848_v56, %v1358_v50  ;;  %vm2976_vm1 = vcmp.lt.f32.partialorder %v1504_v28, 0.0004427343 }
 0x137   :  { %vm499_vm2 = vcmp.ne.f32.partialorder %v2594_v8, %v2594_v8  ;;  %v2982_v3 = vpop.eup %2067  ;;  %1759 = vst [vmem:[#allocation2 + $0x80] sm:$0xff] %v1727_v53  ;;  %v1500_v18 = vmul.f32 0.6931472, %v2066_v7  ;;  %v1503_v4 = vmul.f32 %v2854_v32, %v1502_v36  ;;  %v1252_v48 = vsub.f32 0.0, %v1220_v12  ;;  %v255_v53 = vpop.f32.mrf.mxu0 }
 0x138   :  { %v728_v22 = vmul.f32 %v2842_v57, %v727_v38  ;;  %v2070_v24 = vpop.eup %2069  ;;  %v1362_v56 = vsel %vm2966_vm0, %v1359_v58, %v1356_v13  ;;  %v1492_v28 = vmul.f32 -0.5, %v2917_v54  ;;  %v1372_v50 = vadd.f32 1.0, %v2982_v3 }
 0x139   :  { %vm2992_vm3 = vcmp.lt.f32.partialorder %v729_v14, 0.0004427343  ;;  %v2996_v47 = vpop.eup %2071  ;;  %v1618_v32 = vadd.f32 %v1362_v56, %v1106_v63  ;;  %v1506_v39 = vsel %vm2976_vm1, %v1503_v4, %v1500_v18  ;;  %v1349_v41 = vadd.f32 1.0, %v1348_v33  ;;  %v335_v4 = vpop.f32.mrf.mxu1 }
 0x13a   :  { %v1305_v16 = vmul.f32 1.442695, %v1252_v48  ;;  %v1634_v44 = vadd.f32 %v1506_v39, %v1122_v55  ;;  %2077 = vlog2.f32 %v1372_v50  ;;  %v725_v20 = vmul.f32 0.6931472, %v2070_v24 }
 0x13b   :  { %v566_v57 = vand.u32 2147483647, %v2958_v11  ;;  %v1650_v14 = vsel %vm1138_vm14, %v2762_v25, %v1618_v32  ;;  %vm1137_vm4 = vcmp.ne.f32.partialorder %v2785_v43, %v2785_v43  ;;  %v1351_v63 = vand.u32 2147483647, %v2911_v34 }
 0x13c   :  { %2079 = vpow2.f32 %v1305_v16  ;;  %v867_v15 = vadd.f32 1.0, %v2996_v47  ;;  %v1682_v37 = vadd.f32 -10.0, %v1650_v14  ;;  %v1666_v55 = vsel %vm1154_vm15, %v2767_v42, %v1634_v44 }
 0x13d   :  { %v1493_v38 = vadd.f32 1.0, %v1492_v28  ;;  %v731_v1 = vsel %vm2992_vm3, %v728_v22, %v725_v20  ;;  %v1698_v5 = vadd.f32 -10.0, %v1666_v55  ;;  %v1375_v25 = vmul.f32 -0.5, %v2982_v3 }
 0x13e   :  { %v979_v52 = vadd.f32 %v731_v1, %v467_v27  ;;  %2081 = vlog2.f32 %v867_v15  ;;  %v2074_v36 = vpop.eup %2073  ;;  %v1714_v10 = vsel %vm2867_vm7, %v2617_v31, %v1682_v37  ;;  %v1350_v62 = vmul.f32 %v2911_v34, %v1349_v41 }
 0x13f   :  { %v598_v0 = vsub.f32 0.0, %v566_v57  ;;  %v3027_v42 = vsub.f32 0.5, %v2961_v21  ;;  %1746 = vst [vmem:[#allocation2 + $0x18] sm:$0xff] %v1714_v10  ;;  %v1730_v61 = vsel %vm2867_vm7, %v2645_v6, %v1698_v5  ;;  %v1347_v33 = vmul.f32 0.6931472, %v2074_v36 }
 0x140   :  { %v1495_v27 = vand.u32 2147483647, %v2917_v54  ;;  %v1011_v12 = vsel %vm499_vm2, %v2594_v8, %v979_v52  ;;  %1762 = vst [vmem:[#allocation2 + $0x98] sm:$0xff] %v1730_v61  ;;  %vm1352_vm5 = vcmp.lt.f32.partialorder %v1351_v63, 0.0004427343  ;;  %v1494_v31 = vmul.f32 %v2917_v54, %v1493_v38 }
 0x141   :  { %v1043_v34 = vsub.f32 0.5, %v1011_v12  ;;  %v637_v7 = vmul.f32 1.442695, %v598_v0  ;;  %v2076_v13 = vpop.eup %2075  ;;  %v1353_v58 = vsel %vm1352_vm5, %v1350_v62, %v1347_v33  ;;  %v1376_v60 = vadd.f32 1.0, %v1375_v25 }
 0x142   :  { %v1378_v6 = vand.u32 2147483647, %v2982_v3  ;;  %v582_v18 = vand.u32 2147483647, %v3027_v42  ;;  %v1617_v48 = vadd.f32 %v1353_v58, %v1105_v17  ;;  %v1491_v22 = vmul.f32 0.6931472, %v2076_v13 }
 0x143   :  { %v3042_v8 = vadd.f32 10.0, %v1043_v34  ;;  %2083 = vpow2.f32 %v637_v7  ;;  %vm1153_vm6 = vcmp.ne.f32.partialorder %v2794_v23, %v2794_v23  ;;  %vm1496_vm8 = vcmp.lt.f32.partialorder %v1495_v27, 0.0004427343 }
 0x144   :  { %v614_v54 = vsub.f32 0.0, %v582_v18  ;;  %v3047_v24 = vadd.f32 %v2501_v40, %v255_v53  ;;  %v1649_v56 = vsel %vm1137_vm4, %v2785_v43, %v1617_v48  ;;  %v1497_v28 = vsel %vm1496_vm8, %v1494_v31, %v1491_v22 }
 0x145   :  { %v870_v17 = vmul.f32 -0.5, %v2996_v47  ;;  %v3055_v50 = vadd.f32 %v2501_v40, %v335_v4  ;;  %v1681_v2 = vadd.f32 -10.0, %v1649_v56  ;;  %v3964_v32 = vmax.f32 %v2794_v23, 0.0  ;;  %v1926_v40 = vpop.f32.mrf.mxu0 }
 0x146   :  { %v1203_v41 = vand.u32 2147483647, %v3042_v8  ;;  %v669_v16 = vmul.f32 1.442695, %v614_v54  ;;  %v1108_v44 = vmax.f32 %v2823_v46, 0.0  ;;  %v1377_v20 = vmul.f32 %v2982_v3, %v1376_v60 }
 0x147   :  { %v1633_v39 = vadd.f32 %v1497_v28, %v3964_v32  ;;  %vm3062_vm9 = vcmp.lt.f32.partialorder %v1378_v6, 0.0004427343  ;;  %v3067_v43 = vsub.f32 0.5, %v3047_v24  ;;  %v2078_v14 = vpop.eup %2077  ;;  %v1713_v63 = vsel %vm2867_vm7, %v2671_v45, %v1681_v2  ;;  %v265_v28 = vpop.f32.mrf.mxu0 }
 0x148   :  { %v1235_v37 = vsub.f32 0.0, %v1203_v41  ;;  %2085 = vpow2.f32 %v669_v16  ;;  %1745 = vst [vmem:[#allocation2 + $0x10] sm:$0xff] %v1713_v63  ;;  %v1374_v38 = vmul.f32 0.6931472, %v2078_v14  ;;  %v871_v1 = vadd.f32 1.0, %v870_v17 }
 0x149   :  { %v1665_v15 = vsel %vm1153_vm6, %v2794_v23, %v1633_v39  ;;  %v3076_v3 = vpop.eup %2079  ;;  %v873_v5 = vand.u32 2147483647, %v2996_v47  ;;  %v3081_v45 = vsub.f32 0.5, %v3055_v50  ;;  %v3086_v23 = vld [vmem:[%s3928_s2] ss:$0 sm:$0xff]  ;;  %vm1140_vm10 = vcmp.ne.f32.partialorder %v2823_v46, %v2823_v46 }
 0x14a   :  { %v1697_v55 = vadd.f32 -10.0, %v1665_v15  ;;  %v1516_v25 = vadd.f32 1.0, %v3076_v3  ;;  %v1271_v52 = vmul.f32 1.442695, %v1235_v37  ;;  %v3089_v36 = vadd.f32 %v3086_v23, %v1926_v40 }
 0x14b   :  { %v2082_v10 = vpop.eup %2081  ;;  %v1380_v0 = vsel %vm3062_vm9, %v1377_v20, %v1374_v38  ;;  %v565_v61 = vand.u32 2147483647, %v3067_v43  ;;  %v483_v27 = vmax.f32 %v2777_v49, 0.0  ;;  %v872_v31 = vmul.f32 %v2996_v47, %v871_v1 }
 0x14c   :  { %v1729_v62 = vsel %vm2867_vm7, %v2837_v35, %v1697_v55  ;;  %v1620_v33 = vadd.f32 %v1380_v0, %v1108_v44  ;;  %2087 = vlog2.f32 %v1516_v25  ;;  %v869_v12 = vmul.f32 0.6931472, %v2082_v10 }
 0x14d   :  { %1761 = vst [vmem:[#allocation2 + $0x90] sm:$0xff] %v1729_v62  ;;  %2089 = vpow2.f32 %v1271_v52  ;;  %v597_v34 = vsub.f32 0.0, %v565_v61  ;;  %vm874_vm11 = vcmp.lt.f32.partialorder %v873_v5, 0.0004427343  ;;  %v581_v7 = vand.u32 2147483647, %v3081_v45 }
 0x14e   :  { %v1652_v35 = vsel %vm1140_vm10, %v2823_v46, %v1620_v33  ;;  %v3104_v53 = vsub.f32 0.5, %v3089_v36  ;;  %2091 = vtanh.f32 %v2548_v26  ;;  %v875_v58 = vsel %vm874_vm11, %v872_v31, %v869_v12  ;;  %v1950_v26 = vpop.f32.mrf.mxu1 }
 0x14f   :  { %v1684_v13 = vadd.f32 -10.0, %v1652_v35  ;;  %v635_v60 = vmul.f32 1.442695, %v597_v34  ;;  %2093 = vtanh.f32 %v2571_v51  ;;  %v995_v18 = vadd.f32 %v875_v58, %v483_v27 }
 0x150   :  { %v3107_v6 = vpop.eup %2083  ;;  %v613_v47 = vsub.f32 0.0, %v581_v7  ;;  %v1519_v4 = vmul.f32 -0.5, %v3076_v3  ;;  %vm515_vm12 = vcmp.ne.f32.partialorder %v2777_v49, %v2777_v49  ;;  %v568_v51 = vand.u32 2147483647, %v3104_v53 }
 0x151   :  { %v1716_v46 = vsel %vm2867_vm7, %v2863_v30, %v1684_v13  ;;  %v750_v48 = vadd.f32 1.0, %v3107_v6  ;;  %v1027_v22 = vsel %vm515_vm12, %v2777_v49, %v995_v18  ;;  %2095 = vpow2.f32 %v635_v60 }
 0x152   :  { %1748 = vst [vmem:[#allocation2 + $0x28] sm:$0xff] %v1716_v46  ;;  %v667_v54 = vmul.f32 1.442695, %v613_v47  ;;  %v1059_v56 = vsub.f32 0.5, %v1027_v22  ;;  %v600_v30 = vsub.f32 0.0, %v568_v51  ;;  %v3120_v17 = vadd.f32 %v3086_v23, %v1950_v26 }
 0x153   :  { %2097 = vlog2.f32 %v750_v48  ;;  %v1520_v39 = vadd.f32 1.0, %v1519_v4  ;;  %v3129_v16 = vadd.f32 %v3086_v23, %v265_v28  ;;  %v1522_v44 = vand.u32 2147483647, %v3076_v3 }
 0x154   :  { %2099 = vpow2.f32 %v667_v54  ;;  %v3125_v32 = vadd.f32 10.0, %v1059_v56  ;;  %v641_v41 = vmul.f32 1.442695, %v600_v30  ;;  %v753_v57 = vmul.f32 -0.5, %v3107_v6 }
 0x155   :  { %v3122_v2 = vpop.eup %2085  ;;  %2101 = vtanh.f32 %v2615_v29  ;;  %v3136_v29 = vsub.f32 0.5, %v3120_v17  ;;  %v1124_v15 = vmax.f32 %v2936_v9, 0.0  ;;  %v1521_v55 = vmul.f32 %v3076_v3, %v1520_v39 }
 0x156   :  { %v894_v49 = vadd.f32 1.0, %v3122_v2  ;;  %v1219_v20 = vand.u32 2147483647, %v3125_v32  ;;  %2103 = vtanh.f32 %v2811_v59  ;;  %v3143_v38 = vsub.f32 0.5, %v3129_v16  ;;  %v345_v59 = vpop.f32.mrf.mxu1 }
 0x157   :  { %vm1523_vm13 = vcmp.lt.f32.partialorder %v1522_v44, 0.0004427343  ;;  %v754_v10 = vadd.f32 1.0, %v753_v57  ;;  %v897_v62 = vmul.f32 -0.5, %v3122_v2  ;;  %v584_v0 = vand.u32 2147483647, %v3136_v29 }
 0x158   :  { %2105 = vlog2.f32 %v894_v49  ;;  %v1251_v14 = vsub.f32 0.0, %v1219_v20  ;;  %vm1156_vm14 = vcmp.ne.f32.partialorder %v2936_v9, %v2936_v9  ;;  %v3154_v33 = vadd.f32 %v3086_v23, %v345_v59 }
 0x159   :  { %v2088_v40 = vpop.eup %2087  ;;  %2107 = vpow2.f32 %v641_v41  ;;  %v616_v27 = vsub.f32 0.0, %v584_v0  ;;  %v567_v12 = vand.u32 2147483647, %v3143_v38  ;;  %v470_v35 = vmax.f32 %v2958_v11, 0.0 }
 0x15a   :  { %v3138_v63 = vpop.eup %2089  ;;  %v1518_v37 = vmul.f32 0.6931472, %v2088_v40  ;;  %v1303_v5 = vmul.f32 1.442695, %v1251_v14  ;;  %2109 = vtanh.f32 %v2961_v21  ;;  %v756_v21 = vand.u32 2147483647, %v3107_v6 }
 0x15b   :  { %v1363_v1 = vadd.f32 1.0, %v3138_v63  ;;  %v2092_v25 = vpop.eup %2091  ;;  %vm502_vm15 = vcmp.ne.f32.partialorder %v2958_v11, %v2958_v11  ;;  %v755_v58 = vmul.f32 %v3107_v6, %v754_v10  ;;  %v898_v60 = vadd.f32 1.0, %v897_v62 }
 0x15c   :  { %v1524_v52 = vsel %vm1523_vm13, %v1521_v55, %v1518_v37  ;;  %v3149_v61 = vpop.eup %2093  ;;  %v673_v4 = vmul.f32 1.442695, %v616_v27  ;;  %v599_v48 = vsub.f32 0.0, %v567_v12  ;;  %vm757_vm0 = vcmp.lt.f32.partialorder %v756_v21, 0.0004427343 }
 0x15d   :  { %v1636_v3 = vadd.f32 %v1524_v52, %v1124_v15  ;;  %2111 = vlog2.f32 %v1363_v1  ;;  %v486_v22 = vmax.f32 %v3027_v42, 0.0  ;;  %v1366_v6 = vmul.f32 -0.5, %v3138_v63 }
 0x15e   :  { %2113 = vpow2.f32 %v1303_v5  ;;  %v3158_v31 = vpop.eup %2095  ;;  %v900_v51 = vand.u32 2147483647, %v3122_v2  ;;  %vm518_vm1 = vcmp.ne.f32.partialorder %v3027_v42, %v3027_v42  ;;  %v639_v39 = vmul.f32 1.442695, %v599_v48 }
 0x15f   :  { %v1668_v34 = vsel %vm1156_vm14, %v2936_v9, %v1636_v3  ;;  %2115 = vtanh.f32 %v3047_v24  ;;  %v741_v18 = vadd.f32 1.0, %v3158_v31  ;;  %v3170_v9 = vsub.f32 0.5, %v3154_v33 }
 0x160   :  { %v2098_v7 = vpop.eup %2097  ;;  %v1700_v13 = vadd.f32 -10.0, %v1668_v34  ;;  %v1107_v41 = vmax.f32 %v3042_v8, 0.0  ;;  %v899_v44 = vmul.f32 %v3122_v2, %v898_v60  ;;  %v1369_v40 = vand.u32 2147483647, %v3138_v63 }
 0x161   :  { %v3167_v47 = vpop.eup %2099  ;;  %v752_v46 = vmul.f32 0.6931472, %v2098_v7  ;;  %2117 = vlog2.f32 %v741_v18  ;;  %v583_v20 = vand.u32 2147483647, %v3170_v9  ;;  %vm1139_vm2 = vcmp.ne.f32.partialorder %v3042_v8, %v3042_v8  ;;  %v1929_v18 = vpop.f32.mrf.mxu0 }
 0x162   :  { %v3172_v26 = vpop.eup %2101  ;;  %v1732_v24 = vsel %vm2867_vm7, %v2092_v25, %v1700_v13  ;;  %v885_v56 = vadd.f32 1.0, %v3167_v47  ;;  %2119 = vpow2.f32 %v673_v4  ;;  %v1367_v37 = vadd.f32 1.0, %v1366_v6 }
 0x163   :  { %1764 = vst [vmem:[#allocation2 + $0xa8] sm:$0xff] %v1732_v24  ;;  %v758_v54 = vsel %vm757_vm0, %v755_v58, %v752_v46  ;;  %v3180_v28 = vpop.eup %2103  ;;  %vm901_vm3 = vcmp.lt.f32.partialorder %v900_v51, 0.0004427343  ;;  %v744_v5 = vmul.f32 -0.5, %v3158_v31  ;;  %v615_v25 = vsub.f32 0.0, %v583_v20 }
 0x164   :  { %v982_v30 = vadd.f32 %v758_v54, %v470_v35  ;;  %2121 = vlog2.f32 %v885_v56  ;;  %v888_v10 = vmul.f32 -0.5, %v3167_v47  ;;  %vm3204_vm4 = vcmp.lt.f32.partialorder %v1369_v40, 0.0004427343 }
 0x165   :  { %v2106_v49 = vpop.eup %2105  ;;  %2123 = vpow2.f32 %v639_v39  ;;  %v469_v3 = vmax.f32 %v3067_v43, 0.0  ;;  %v747_v21 = vand.u32 2147483647, %v3158_v31  ;;  %v1368_v12 = vmul.f32 %v3138_v63, %v1367_v37 }
 0x166   :  { %v3187_v57 = vpop.eup %2107  ;;  %v1014_v14 = vsel %vm502_vm15, %v2958_v11, %v982_v30  ;;  %v896_v15 = vmul.f32 0.6931472, %v2106_v49  ;;  %2125 = vtanh.f32 %v3055_v50  ;;  %v671_v35 = vmul.f32 1.442695, %v615_v25 }
 0x167   :  { %v1046_v55 = vsub.f32 0.5, %v1014_v14  ;;  %v768_v2 = vadd.f32 1.0, %v3187_v57  ;;  %v3197_v59 = vpop.eup %2109  ;;  %vm501_vm5 = vcmp.ne.f32.partialorder %v3067_v43, %v3067_v43  ;;  %v891_v60 = vand.u32 2147483647, %v3167_v47 }
 0x168   :  { %v902_v1 = vsel %vm901_vm3, %v899_v44, %v896_v15  ;;  %v889_v48 = vadd.f32 1.0, %v888_v10  ;;  %v771_v6 = vmul.f32 -0.5, %v3187_v57  ;;  %vm517_vm6 = vcmp.ne.f32.partialorder %v3081_v45, %v3081_v45 }
 0x169   :  { %v3201_v52 = vadd.f32 10.0, %v1046_v55  ;;  %v998_v11 = vadd.f32 %v902_v1, %v486_v22  ;;  %2127 = vlog2.f32 %v768_v2  ;;  %v485_v22 = vmax.f32 %v3081_v45, 0.0 }
 0x16a   :  { %v2112_v62 = vpop.eup %2111  ;;  %2129 = vtanh.f32 %v3089_v36  ;;  %v745_v36 = vadd.f32 1.0, %v744_v5  ;;  %v3234_v56 = vadd.f32 %v3086_v23, %v1929_v18  ;;  %vm748_vm8 = vcmp.lt.f32.partialorder %v747_v21, 0.0004427343 }
 0x16b   :  { %v3211_v27 = vpop.eup %2113  ;;  %v1365_v50 = vmul.f32 0.6931472, %v2112_v62  ;;  %v1206_v34 = vand.u32 2147483647, %v3201_v52  ;;  %v1030_v58 = vsel %vm518_vm1, %v3027_v42, %v998_v11  ;;  %v890_v20 = vmul.f32 %v3167_v47, %v889_v48 }
 0x16c   :  { %v3215_v7 = vpop.eup %2115  ;;  %v1507_v13 = vadd.f32 1.0, %v3211_v27  ;;  %v1062_v4 = vsub.f32 0.5, %v1030_v58  ;;  %v746_v49 = vmul.f32 %v3158_v31, %v745_v36  ;;  %vm3244_vm9 = vcmp.lt.f32.partialorder %v891_v60, 0.0004427343 }
 0x16d   :  { %v1371_v63 = vsel %vm3204_vm4, %v1368_v12, %v1365_v50  ;;  %v1238_v46 = vsub.f32 0.0, %v1206_v34  ;;  %v772_v55 = vadd.f32 1.0, %v771_v6  ;;  %v1510_v1 = vmul.f32 -0.5, %v3211_v27 }
 0x16e   :  { %v1619_v24 = vadd.f32 %v1371_v63, %v1107_v41  ;;  %2131 = vlog2.f32 %v1507_v13  ;;  %v2118_v42 = vpop.eup %2117  ;;  %v3229_v51 = vadd.f32 10.0, %v1062_v4  ;;  %v774_v11 = vand.u32 2147483647, %v3187_v57 }
 0x16f   :  { %v1277_v54 = vmul.f32 1.442695, %v1238_v46  ;;  %2133 = vpow2.f32 %v671_v35  ;;  %v743_v39 = vmul.f32 0.6931472, %v2118_v42  ;;  %v3241_v41 = vpop.eup %2119  ;;  %v3268_v21 = vsub.f32 0.5, %v3234_v56 }
 0x170   :  { %v1651_v30 = vsel %vm1139_vm2, %v3042_v8, %v1619_v24  ;;  %v1222_v15 = vand.u32 2147483647, %v3229_v51  ;;  %v912_v8 = vadd.f32 1.0, %v3241_v41  ;;  %vm504_vm10 = vcmp.ne.f32.partialorder %v3104_v53, %v3104_v53 }
 0x171   :  { %v1683_v44 = vadd.f32 -10.0, %v1651_v30  ;;  %2135 = vpow2.f32 %v1277_v54  ;;  %v2122_v14 = vpop.eup %2121  ;;  %v749_v37 = vsel %vm748_vm8, %v746_v49, %v743_v39  ;;  %v1511_v58 = vadd.f32 1.0, %v1510_v1 }
 0x172   :  { %v3250_v2 = vpop.eup %2123  ;;  %v981_v47 = vadd.f32 %v749_v37, %v469_v3  ;;  %v887_v5 = vmul.f32 0.6931472, %v2122_v14  ;;  %v1254_v25 = vsub.f32 0.0, %v1222_v15  ;;  %2137 = vlog2.f32 %v912_v8 }
 0x173   :  { %v1715_v31 = vsel %vm2867_vm7, %v3149_v61, %v1683_v44  ;;  %v759_v10 = vadd.f32 1.0, %v3250_v2  ;;  %v3258_v62 = vpop.eup %2125  ;;  %v472_v3 = vmax.f32 %v3104_v53, 0.0  ;;  %vm775_vm11 = vcmp.lt.f32.partialorder %v774_v11, 0.0004427343 }
 0x174   :  { %1747 = vst [vmem:[#allocation2 + $0x20] sm:$0xff] %v1715_v31  ;;  %v1013_v0 = vsel %vm501_vm5, %v3067_v43, %v981_v47  ;;  %v893_v61 = vsel %vm3244_vm9, %v890_v20, %v887_v5  ;;  %v1309_v12 = vmul.f32 1.442695, %v1254_v25  ;;  %v773_v43 = vmul.f32 %v3187_v57, %v772_v55 }
 0x175   :  { %v1045_v34 = vsub.f32 0.5, %v1013_v0  ;;  %v997_v35 = vadd.f32 %v893_v61, %v485_v22  ;;  %2139 = vlog2.f32 %v759_v10  ;;  %v1513_v63 = vand.u32 2147483647, %v3211_v27 }
 0x176   :  { %v2128_v50 = vpop.eup %2127  ;;  %2141 = vpow2.f32 %v1309_v12  ;;  %v570_v48 = vand.u32 2147483647, %v3268_v21  ;;  %v1123_v24 = vmax.f32 %v3125_v32, 0.0  ;;  %vm1155_vm12 = vcmp.ne.f32.partialorder %v3125_v32, %v3125_v32 }
 0x177   :  { %v3272_v13 = vpop.eup %2129  ;;  %v770_v36 = vmul.f32 0.6931472, %v2128_v50  ;;  %v3275_v60 = vadd.f32 10.0, %v1045_v34  ;;  %v1029_v18 = vsel %vm517_vm6, %v3081_v45, %v997_v35  ;;  %v1512_v42 = vmul.f32 %v3211_v27, %v1511_v58 }
 0x178   :  { %v1061_v46 = vsub.f32 0.5, %v1029_v18  ;;  %2143 = vtanh.f32 %v3120_v17  ;;  %v915_v45 = vmul.f32 -0.5, %v3241_v41  ;;  %v762_v20 = vmul.f32 -0.5, %v3250_v2 }
 0x179   :  { %v776_v4 = vsel %vm775_vm11, %v773_v43, %v770_v36  ;;  %v1205_v57 = vand.u32 2147483647, %v3275_v60  ;;  %vm1514_vm13 = vcmp.lt.f32.partialorder %v1513_v63, 0.0004427343  ;;  %v602_v14 = vsub.f32 0.0, %v570_v48  ;;  %v1953_v36 = vpop.f32.mrf.mxu1 }
 0x17a   :  { %v984_v22 = vadd.f32 %v776_v4, %v472_v3  ;;  %v3288_v54 = vadd.f32 10.0, %v1061_v46  ;;  %v488_v55 = vmax.f32 %v3136_v29, 0.0  ;;  %v918_v8 = vand.u32 2147483647, %v3241_v41 }
 0x17b   :  { %v2132_v6 = vpop.eup %2131  ;;  %v1237_v49 = vsub.f32 0.0, %v1205_v57  ;;  %v916_v47 = vadd.f32 1.0, %v915_v45  ;;  %v763_v11 = vadd.f32 1.0, %v762_v20  ;;  %vm520_vm14 = vcmp.ne.f32.partialorder %v3136_v29, %v3136_v29 }
 0x17c   :  { %v3292_v30 = vpop.eup %2133  ;;  %v1509_v39 = vmul.f32 0.6931472, %v2132_v6  ;;  %v1016_v44 = vsel %vm504_vm10, %v3104_v53, %v984_v22  ;;  %v1221_v27 = vand.u32 2147483647, %v3288_v54  ;;  %v645_v61 = vmul.f32 1.442695, %v602_v14 }
 0x17d   :  { %v1048_v40 = vsub.f32 0.5, %v1016_v44  ;;  %v1275_v37 = vmul.f32 1.442695, %v1237_v49  ;;  %v903_v53 = vadd.f32 1.0, %v3292_v30  ;;  %v765_v12 = vand.u32 2147483647, %v3250_v2 }
 0x17e   :  { %v3300_v15 = vpop.eup %2135  ;;  %v1515_v17 = vsel %vm1514_vm13, %v1512_v42, %v1509_v39  ;;  %v1253_v5 = vsub.f32 0.0, %v1221_v27  ;;  %v917_v58 = vmul.f32 %v3241_v41, %v916_v47  ;;  %vm919_vm15 = vcmp.lt.f32.partialorder %v918_v8, 0.0004427343  ;;  %v275_v39 = vpop.f32.mrf.mxu0 }
 0x17f   :  { %v1635_v31 = vadd.f32 %v1515_v17, %v1123_v24  ;;  %v1390_v1 = vadd.f32 1.0, %v3300_v15  ;;  %2145 = vpow2.f32 %v1275_v37  ;;  %v3306_v25 = vadd.f32 10.0, %v1048_v40  ;;  %v2138_v10 = vpop.eup %2137 }
 0x180   :  { %v1307_v50 = vmul.f32 1.442695, %v1253_v5  ;;  %v914_v35 = vmul.f32 0.6931472, %v2138_v10  ;;  %v764_v18 = vmul.f32 %v3250_v2, %v763_v11  ;;  %vm766_vm0 = vcmp.lt.f32.partialorder %v765_v12, 0.0004427343 }
 0x181   :  { %v1667_v0 = vsel %vm1155_vm12, %v3125_v32, %v1635_v31  ;;  %2147 = vlog2.f32 %v1390_v1  ;;  %v1208_v34 = vand.u32 2147483647, %v3306_v25  ;;  %v3326_v24 = vadd.f32 %v3086_v23, %v1953_v36 }
 0x182   :  { %v1699_v3 = vadd.f32 -10.0, %v1667_v0  ;;  %2149 = vtanh.f32 %v3129_v16  ;;  %v2140_v43 = vpop.eup %2139  ;;  %v920_v46 = vsel %vm919_vm15, %v917_v58, %v914_v35  ;;  %v471_v22 = vmax.f32 %v3143_v38, 0.0 }
 0x183   :  { %2151 = vlog2.f32 %v903_v53  ;;  %v3322_v63 = vpop.eup %2141  ;;  %v1240_v16 = vsub.f32 0.0, %v1208_v34  ;;  %v761_v4 = vmul.f32 0.6931472, %v2140_v43  ;;  %v1000_v48 = vadd.f32 %v920_v46, %v488_v55 }
 0x184   :  { %v1731_v32 = vsel %vm2867_vm7, %v3172_v26, %v1699_v3  ;;  %2153 = vpow2.f32 %v1307_v50  ;;  %v1534_v41 = vadd.f32 1.0, %v3322_v63  ;;  %v1393_v26 = vmul.f32 -0.5, %v3300_v15 }
 0x185   :  { %1763 = vst [vmem:[#allocation2 + $0xa0] sm:$0xff] %v1731_v32  ;;  %2155 = vpow2.f32 %v645_v61  ;;  %v1281_v57 = vmul.f32 1.442695, %v1240_v16  ;;  %v767_v2 = vsel %vm766_vm0, %v764_v18, %v761_v4  ;;  %v3330_v6 = vpop.eup %2143  ;;  %v1032_v42 = vsel %vm520_vm14, %v3136_v29, %v1000_v48 }
 0x186   :  { %2157 = vlog2.f32 %v1534_v41  ;;  %v906_v45 = vmul.f32 -0.5, %v3292_v30  ;;  %v1064_v49 = vsub.f32 0.5, %v1032_v42  ;;  %vm503_vm1 = vcmp.ne.f32.partialorder %v3143_v38, %v3143_v38 }
 0x187   :  { %2159 = vpow2.f32 %v1281_v57  ;;  %v983_v44 = vadd.f32 %v767_v2, %v471_v22  ;;  %v487_v20 = vmax.f32 %v3170_v9, 0.0  ;;  %v474_v27 = vmax.f32 %v3268_v21, 0.0 }
 0x188   :  { %2161 = vtanh.f32 %v3154_v33  ;;  %v3343_v40 = vsub.f32 0.5, %v3326_v24  ;;  %v1394_v14 = vadd.f32 1.0, %v1393_v26  ;;  %v3345_v29 = vadd.f32 10.0, %v1064_v49 }
 0x189   :  { %v1015_v17 = vsel %vm503_vm1, %v3143_v38, %v983_v44  ;;  %v3349_v37 = vadd.f32 %v3086_v23, %v275_v39  ;;  %v1396_v55 = vand.u32 2147483647, %v3300_v15  ;;  %v1537_v8 = vmul.f32 -0.5, %v3322_v63 }
 0x18a   :  { %v1047_v33 = vsub.f32 0.5, %v1015_v17  ;;  %v907_v31 = vadd.f32 1.0, %v906_v45  ;;  %v1110_v47 = vmax.f32 %v3201_v52, 0.0  ;;  %vm1142_vm2 = vcmp.ne.f32.partialorder %v3201_v52, %v3201_v52 }
 0x18b   :  { %v1126_v53 = vmax.f32 %v3229_v51, 0.0  ;;  %v1224_v38 = vand.u32 2147483647, %v3345_v29  ;;  %v909_v0 = vand.u32 2147483647, %v3292_v30  ;;  %v1395_v12 = vmul.f32 %v3300_v15, %v1394_v14 }
 0x18c   :  { %v3353_v1 = vpop.eup %2145  ;;  %v3361_v10 = vadd.f32 10.0, %v1047_v33  ;;  %v586_v61 = vand.u32 2147483647, %v3343_v40  ;;  %vm519_vm3 = vcmp.ne.f32.partialorder %v3170_v9, %v3170_v9  ;;  %v3371_v35 = vsub.f32 0.5, %v3349_v37 }
 0x18d   :  { %v1381_v11 = vadd.f32 1.0, %v3353_v1  ;;  %v1256_v34 = vsub.f32 0.0, %v1224_v38  ;;  %vm1397_vm4 = vcmp.lt.f32.partialorder %v1396_v55, 0.0004427343  ;;  %v1538_v36 = vadd.f32 1.0, %v1537_v8 }
 0x18e   :  { %v2148_v5 = vpop.eup %2147  ;;  %v908_v43 = vmul.f32 %v3292_v30, %v907_v31  ;;  %v1540_v16 = vand.u32 2147483647, %v3322_v63  ;;  %v1207_v15 = vand.u32 2147483647, %v3361_v10  ;;  %vm3381_vm5 = vcmp.lt.f32.partialorder %v909_v0, 0.0004427343 }
 0x18f   :  { %v3365_v3 = vpop.eup %2149  ;;  %v1392_v50 = vmul.f32 0.6931472, %v2148_v5  ;;  %2163 = vlog2.f32 %v1381_v11  ;;  %v1313_v46 = vmul.f32 1.442695, %v1256_v34  ;;  %v618_v57 = vsub.f32 0.0, %v586_v61  ;;  %v355_v11 = vpop.f32.mrf.mxu1 }
 0x190   :  { %v2152_v58 = vpop.eup %2151  ;;  %v1239_v30 = vsub.f32 0.0, %v1207_v15  ;;  %v569_v2 = vand.u32 2147483647, %v3371_v35  ;;  %v1539_v45 = vmul.f32 %v3322_v63, %v1538_v36  ;;  %v1384_v14 = vmul.f32 -0.5, %v3353_v1  ;;  %v1932_v36 = vpop.f32.mrf.mxu0 }
 0x191   :  { %v3374_v32 = vpop.eup %2153  ;;  %v1398_v18 = vsel %vm1397_vm4, %v1395_v12, %v1392_v50  ;;  %2165 = vpow2.f32 %v1313_v46  ;;  %v905_v22 = vmul.f32 0.6931472, %v2152_v58  ;;  %vm1541_vm6 = vcmp.lt.f32.partialorder %v1540_v16, 0.0004427343 }
 0x192   :  { %v3378_v4 = vpop.eup %2155  ;;  %v1622_v41 = vadd.f32 %v1398_v18, %v1110_v47  ;;  %v1525_v48 = vadd.f32 1.0, %v3374_v32  ;;  %v1279_v17 = vmul.f32 1.442695, %v1239_v30  ;;  %v677_v47 = vmul.f32 1.442695, %v618_v57 }
 0x193   :  { %v786_v39 = vadd.f32 1.0, %v3378_v4  ;;  %v2158_v49 = vpop.eup %2157  ;;  %v911_v55 = vsel %vm3381_vm5, %v908_v43, %v905_v22  ;;  %v601_v5 = vsub.f32 0.0, %v569_v2  ;;  %v1528_v61 = vmul.f32 -0.5, %v3374_v32 }
 0x194   :  { %v1654_v42 = vsel %vm1142_vm2, %v3201_v52, %v1622_v41  ;;  %2167 = vlog2.f32 %v1525_v48  ;;  %v3395_v8 = vpop.eup %2159  ;;  %v1536_v33 = vmul.f32 0.6931472, %v2158_v49  ;;  %v999_v31 = vadd.f32 %v911_v55, %v487_v20 }
 0x195   :  { %v1686_v44 = vadd.f32 -10.0, %v1654_v42  ;;  %2169 = vlog2.f32 %v786_v39  ;;  %v3397_v52 = vpop.eup %2161  ;;  %v1408_v38 = vadd.f32 1.0, %v3395_v8  ;;  %vm1158_vm8 = vcmp.ne.f32.partialorder %v3229_v51, %v3229_v51 }
 0x196   :  { %v1542_v0 = vsel %vm1541_vm6, %v1539_v45, %v1536_v33  ;;  %2171 = vpow2.f32 %v1279_v17  ;;  %v1031_v20 = vsel %vm519_vm3, %v3170_v9, %v999_v31  ;;  %v1385_v12 = vadd.f32 1.0, %v1384_v14 }
 0x197   :  { %v1718_v63 = vsel %vm2867_vm7, %v3180_v28, %v1686_v44  ;;  %v1638_v50 = vadd.f32 %v1542_v0, %v1126_v53  ;;  %v1109_v28 = vmax.f32 %v3275_v60, 0.0  ;;  %2173 = vlog2.f32 %v1408_v38 }
 0x198   :  { %1750 = vst [vmem:[#allocation2 + $0x38] sm:$0xff] %v1718_v63  ;;  %v1063_v34 = vsub.f32 0.5, %v1031_v20  ;;  %2175 = vpow2.f32 %v677_v47  ;;  %v3412_v58 = vadd.f32 %v3086_v23, %v355_v11  ;;  %vm1141_vm9 = vcmp.ne.f32.partialorder %v3275_v60, %v3275_v60 }
 0x199   :  { %v1670_v43 = vsel %vm1158_vm8, %v3229_v51, %v1638_v50  ;;  %v1387_v9 = vand.u32 2147483647, %v3353_v1  ;;  %v643_v18 = vmul.f32 1.442695, %v601_v5  ;;  %v1529_v53 = vadd.f32 1.0, %v1528_v61 }
 0x19a   :  { %v1702_v16 = vadd.f32 -10.0, %v1670_v43  ;;  %v1411_v46 = vmul.f32 -0.5, %v3395_v8  ;;  %v3419_v15 = vadd.f32 10.0, %v1063_v34  ;;  %v1125_v48 = vmax.f32 %v3288_v54, 0.0 }
 0x19b   :  { %v789_v26 = vmul.f32 -0.5, %v3378_v4  ;;  %2177 = vpow2.f32 %v643_v18  ;;  %v3424_v51 = vadd.f32 %v3086_v23, %v1932_v36  ;;  %v1386_v22 = vmul.f32 %v3353_v1, %v1385_v12 }
 0x19c   :  { %v2164_v41 = vpop.eup %2163  ;;  %v1734_v57 = vsel %vm2867_vm7, %v3197_v59, %v1702_v16  ;;  %v3431_v2 = vsub.f32 0.5, %v3412_v58  ;;  %vm1388_vm10 = vcmp.lt.f32.partialorder %v1387_v9, 0.0004427343  ;;  %vm1157_vm11 = vcmp.ne.f32.partialorder %v3288_v54, %v3288_v54 }
 0x19d   :  { %v1383_v30 = vmul.f32 0.6931472, %v2164_v41  ;;  %1766 = vst [vmem:[#allocation2 + $0xb8] sm:$0xff] %v1734_v57  ;;  %v1531_v42 = vand.u32 2147483647, %v3374_v32  ;;  %v1530_v59 = vmul.f32 %v3374_v32, %v1529_v53  ;;  %v1112_v44 = vmax.f32 %v3306_v25, 0.0 }
 0x19e   :  { %v1223_v45 = vand.u32 2147483647, %v3419_v15  ;;  %v3437_v39 = vpop.eup %2165  ;;  %v1412_v1 = vadd.f32 1.0, %v1411_v46  ;;  %v790_v33 = vadd.f32 1.0, %v789_v26  ;;  %v792_v31 = vand.u32 2147483647, %v3378_v4 }
 0x19f   :  { %v1389_v49 = vsel %vm1388_vm10, %v1386_v22, %v1383_v30  ;;  %v1552_v55 = vadd.f32 1.0, %v3437_v39  ;;  %vm506_vm12 = vcmp.ne.f32.partialorder %v3268_v21, %v3268_v21  ;;  %v585_v38 = vand.u32 2147483647, %v3431_v2 }
 0x1a0   :  { %v1621_v17 = vadd.f32 %v1389_v49, %v1109_v28  ;;  %v1255_v63 = vsub.f32 0.0, %v1223_v45  ;;  %v3447_v5 = vsub.f32 0.5, %v3424_v51  ;;  %vm1532_vm13 = vcmp.lt.f32.partialorder %v1531_v42, 0.0004427343 }
 0x1a1   :  { %v2168_v14 = vpop.eup %2167  ;;  %v1414_v0 = vand.u32 2147483647, %v3395_v8  ;;  %2179 = vlog2.f32 %v1552_v55  ;;  %v1413_v36 = vmul.f32 %v3395_v8, %v1412_v1  ;;  %v791_v43 = vmul.f32 %v3378_v4, %v790_v33 }
 0x1a2   :  { %v1527_v47 = vmul.f32 0.6931472, %v2168_v14  ;;  %v2170_v32 = vpop.eup %2169  ;;  %v1653_v11 = vsel %vm1141_vm9, %v3275_v60, %v1621_v17  ;;  %v1311_v50 = vmul.f32 1.442695, %v1255_v63  ;;  %vm3458_vm14 = vcmp.lt.f32.partialorder %v792_v31, 0.0004427343 }
 0x1a3   :  { %v1685_v61 = vadd.f32 -10.0, %v1653_v11  ;;  %v788_v28 = vmul.f32 0.6931472, %v2170_v32  ;;  %v3454_v12 = vpop.eup %2171  ;;  %v617_v53 = vsub.f32 0.0, %v585_v38  ;;  %v572_v46 = vand.u32 2147483647, %v3447_v5 }
 0x1a4   :  { %v1533_v20 = vsel %vm1532_vm13, %v1530_v59, %v1527_v47  ;;  %v2174_v60 = vpop.eup %2173  ;;  %v1399_v16 = vadd.f32 1.0, %v3454_v12  ;;  %2181 = vpow2.f32 %v1311_v50  ;;  %vm1144_vm15 = vcmp.ne.f32.partialorder %v3306_v25, %v3306_v25 }
 0x1a5   :  { %v1637_v34 = vadd.f32 %v1533_v20, %v1125_v48  ;;  %v1717_v18 = vsel %vm2867_vm7, %v3215_v7, %v1685_v61  ;;  %v3467_v41 = vpop.eup %2175  ;;  %v1410_v8 = vmul.f32 0.6931472, %v2174_v60  ;;  %v794_v48 = vsel %vm3458_vm14, %v791_v43, %v788_v28  ;;  %v1956_v7 = vpop.f32.mrf.mxu1 }
 0x1a6   :  { %1749 = vst [vmem:[#allocation2 + $0x30] sm:$0xff] %v1717_v18  ;;  %vm1415_vm0 = vcmp.lt.f32.partialorder %v1414_v0, 0.0004427343  ;;  %2183 = vlog2.f32 %v1399_v16  ;;  %v1555_v30 = vmul.f32 -0.5, %v3437_v39  ;;  %v986_v22 = vadd.f32 %v794_v48, %v474_v27 }
 0x1a7   :  { %v1669_v4 = vsel %vm1157_vm11, %v3288_v54, %v1637_v34  ;;  %v1416_v57 = vsel %vm1415_vm0, %v1413_v36, %v1410_v8  ;;  %v930_v54 = vadd.f32 1.0, %v3467_v41  ;;  %v675_v59 = vmul.f32 1.442695, %v617_v53 }
 0x1a8   :  { %v1701_v26 = vadd.f32 -10.0, %v1669_v4  ;;  %v3481_v42 = vpop.eup %2177  ;;  %v1624_v49 = vadd.f32 %v1416_v57, %v1112_v44  ;;  %v604_v1 = vsub.f32 0.0, %v572_v46  ;;  %v1018_v14 = vsel %vm506_vm12, %v3268_v21, %v986_v22 }
 0x1a9   :  { %2185 = vlog2.f32 %v930_v54  ;;  %v777_v27 = vadd.f32 1.0, %v3481_v42  ;;  %v3492_v17 = vadd.f32 %v3086_v23, %v1956_v7  ;;  %v1402_v44 = vmul.f32 -0.5, %v3454_v12 }
 0x1aa   :  { %v1733_v45 = vsel %vm2867_vm7, %v3258_v62, %v1701_v26  ;;  %v1656_v62 = vsel %vm1144_vm15, %v3306_v25, %v1624_v49  ;;  %2187 = vtanh.f32 %v3234_v56  ;;  %v1050_v55 = vsub.f32 0.5, %v1018_v14  ;;  %v285_v56 = vpop.f32.mrf.mxu0 }
 0x1ab   :  { %1765 = vst [vmem:[#allocation2 + $0xb0] sm:$0xff] %v1733_v45  ;;  %v1688_v33 = vadd.f32 -10.0, %v1656_v62  ;;  %v1556_v31 = vadd.f32 1.0, %v1555_v30  ;;  %2189 = vlog2.f32 %v777_v27  ;;  %v1558_v21 = vand.u32 2147483647, %v3437_v39 }
 0x1ac   :  { %v3501_v47 = vadd.f32 10.0, %v1050_v55  ;;  %2191 = vpow2.f32 %v675_v59  ;;  %v649_v63 = vmul.f32 1.442695, %v604_v1  ;;  %v3508_v25 = vsub.f32 0.5, %v3492_v17 }
 0x1ad   :  { %v1720_v38 = vsel %vm2867_vm7, %v3272_v13, %v1688_v33  ;;  %2193 = vtanh.f32 %v3326_v24  ;;  %v1128_v11 = vmax.f32 %v3345_v29, 0.0  ;;  %vm1160_vm1 = vcmp.ne.f32.partialorder %v3345_v29, %v3345_v29 }
 0x1ae   :  { %v2180_v32 = vpop.eup %2179  ;;  %1752 = vst [vmem:[#allocation2 + $0x48] sm:$0xff] %v1720_v38  ;;  %v1403_v0 = vadd.f32 1.0, %v1402_v44  ;;  %v1210_v61 = vand.u32 2147483647, %v3501_v47  ;;  %v1557_v50 = vmul.f32 %v3437_v39, %v1556_v31  ;;  %v933_v13 = vmul.f32 -0.5, %v3467_v41 }
 0x1af   :  { %v1554_v20 = vmul.f32 0.6931472, %v2180_v32  ;;  %2195 = vpow2.f32 %v649_v63  ;;  %vm1559_vm2 = vcmp.lt.f32.partialorder %v1558_v21, 0.0004427343  ;;  %v588_v28 = vand.u32 2147483647, %v3508_v25 }
 0x1b0   :  { %v1242_v24 = vsub.f32 0.0, %v1210_v61  ;;  %v3518_v34 = vadd.f32 %v3086_v23, %v285_v56  ;;  %v1111_v43 = vmax.f32 %v3361_v10, 0.0  ;;  %v1405_v9 = vand.u32 2147483647, %v3454_v12 }
 0x1b1   :  { %v1560_v36 = vsel %vm1559_vm2, %v1557_v50, %v1554_v20  ;;  %v780_v60 = vmul.f32 -0.5, %v3481_v42  ;;  %v3523_v18 = vpop.eup %2181  ;;  %v1404_v16 = vmul.f32 %v3454_v12, %v1403_v0  ;;  %v620_v46 = vsub.f32 0.0, %v588_v28  ;;  %v365_v50 = vpop.f32.mrf.mxu1 }
 0x1b2   :  { %v1640_v39 = vadd.f32 %v1560_v36, %v1128_v11  ;;  %v1285_v53 = vmul.f32 1.442695, %v1242_v24  ;;  %v1543_v8 = vadd.f32 1.0, %v3523_v18  ;;  %v934_v48 = vadd.f32 1.0, %v933_v13 }
 0x1b3   :  { %v2184_v4 = vpop.eup %2183  ;;  %v936_v23 = vand.u32 2147483647, %v3467_v41  ;;  %v3529_v26 = vsub.f32 0.5, %v3518_v34  ;;  %v681_v30 = vmul.f32 1.442695, %v620_v46  ;;  %v781_v22 = vadd.f32 1.0, %v780_v60 }
 0x1b4   :  { %v1672_v7 = vsel %vm1160_vm1, %v3345_v29, %v1640_v39  ;;  %v1401_v57 = vmul.f32 0.6931472, %v2184_v4  ;;  %2197 = vpow2.f32 %v1285_v53  ;;  %vm1406_vm3 = vcmp.lt.f32.partialorder %v1405_v9, 0.0004427343 }
 0x1b5   :  { %v1704_v12 = vadd.f32 -10.0, %v1672_v7  ;;  %2199 = vlog2.f32 %v1543_v8  ;;  %v490_v49 = vmax.f32 %v3343_v40, 0.0  ;;  %v783_v59 = vand.u32 2147483647, %v3481_v42 }
 0x1b6   :  { %v2186_v54 = vpop.eup %2185  ;;  %v1407_v45 = vsel %vm1406_vm3, %v1404_v16, %v1401_v57  ;;  %2201 = vpow2.f32 %v681_v30  ;;  %v935_v62 = vmul.f32 %v3467_v41, %v934_v48  ;;  %vm1143_vm4 = vcmp.ne.f32.partialorder %v3361_v10, %v3361_v10  ;;  %v1935_v16 = vpop.f32.mrf.mxu0 }
 0x1b7   :  { %v3537_v1 = vpop.eup %2187  ;;  %v1736_v29 = vsel %vm2867_vm7, %v3330_v6, %v1704_v12  ;;  %v1623_v14 = vadd.f32 %v1407_v45, %v1111_v43  ;;  %v932_v27 = vmul.f32 0.6931472, %v2186_v54  ;;  %vm937_vm5 = vcmp.lt.f32.partialorder %v936_v23, 0.0004427343 }
 0x1b8   :  { %v2190_v44 = vpop.eup %2189  ;;  %1768 = vst [vmem:[#allocation2 + $0xc8] sm:$0xff] %v1736_v29  ;;  %v473_v55 = vmax.f32 %v3371_v35, 0.0  ;;  %v571_v33 = vand.u32 2147483647, %v3529_v26  ;;  %v782_v38 = vmul.f32 %v3481_v42, %v781_v22  ;;  %vm784_vm6 = vcmp.lt.f32.partialorder %v783_v59, 0.0004427343 }
 0x1b9   :  { %v3547_v31 = vpop.eup %2191  ;;  %v1655_v21 = vsel %vm1143_vm4, %v3361_v10, %v1623_v14  ;;  %v938_v63 = vsel %vm937_vm5, %v935_v62, %v932_v27  ;;  %v779_v6 = vmul.f32 0.6931472, %v2190_v44  ;;  %v1546_v0 = vmul.f32 -0.5, %v3523_v18 }
 0x1ba   :  { %v3551_v56 = vpop.eup %2193  ;;  %v1687_v41 = vadd.f32 -10.0, %v1655_v21  ;;  %v1002_v32 = vadd.f32 %v938_v63, %v490_v49  ;;  %v921_v11 = vadd.f32 1.0, %v3547_v31  ;;  %vm522_vm8 = vcmp.ne.f32.partialorder %v3343_v40, %v3343_v40  ;;  %v1959_v49 = vpop.f32.mrf.mxu1 }
 0x1bb   :  { %v785_v61 = vsel %vm784_vm6, %v782_v38, %v779_v6  ;;  %v603_v20 = vsub.f32 0.0, %v571_v33  ;;  %vm505_vm9 = vcmp.ne.f32.partialorder %v3371_v35, %v3371_v35  ;;  %v1547_v60 = vadd.f32 1.0, %v1546_v0 }
 0x1bc   :  { %v3557_v10 = vpop.eup %2195  ;;  %v1719_v42 = vsel %vm2867_vm7, %v3365_v3, %v1687_v41  ;;  %v1034_v13 = vsel %vm522_vm8, %v3343_v40, %v1002_v32  ;;  %v985_v24 = vadd.f32 %v785_v61, %v473_v55  ;;  %2203 = vlog2.f32 %v921_v11  ;;  %v3572_v40 = vld [vmem:[%s3928_s2] ss:$0 sm:$0xff]  ;;  %s2323_s2 = smov [#allocation2]  }
 0x1bd   :  { %1751 = vst [vmem:[#allocation2 + $0x40] sm:$0xff] %v1719_v42  ;;  %v1066_v28 = vsub.f32 0.5, %v1034_v13  ;;  %2205 = vtanh.f32 %v3349_v37  ;;  %v804_v36 = vadd.f32 1.0, %v3557_v10  ;;  %v647_v9 = vmul.f32 1.442695, %v603_v20  ;;  %v295_v13 = vpop.f32.mrf.mxu0  ;;  %s1780_s13 = sshll.u32 %s2323_s2, 4  ;;  %s1781_s13 = int_to_ptr.vmem [resolvable:$true] %s1780_s13 }
 0x1be   :  { %v1017_v43 = vsel %vm505_vm9, %v3371_v35, %v985_v24  ;;  %2207 = vtanh.f32 %v3412_v58  ;;  %v3575_v3 = vadd.f32 %v3572_v40, %v365_v50  ;;  %v1549_v53 = vand.u32 2147483647, %v3523_v18  ;;  %s2301_s14 = scalar_lea.vmem %s1781_s13, 4096  ;;  %p2306_p1 = scmp.lt.s32.totalorder %s1781_s13, %s1781_s13 }
 0x1bf   :  { %v3577_v37 = vadd.f32 10.0, %v1066_v28  ;;  %v1049_v39 = vsub.f32 0.5, %v1017_v43  ;;  %2209 = vlog2.f32 %v804_v36  ;;  %v1127_v58 = vmax.f32 %v3419_v15, 0.0  ;;  %p2302_p0 = scmp.ne.s32.totalorder %s1781_s13, %s2301_s14  ;;  %p2307_p2 = scmp.lt.s32.totalorder %s2301_s14, %s2301_s14 }
 0x1c0   :  { %2211 = vpow2.f32 %v647_v9  ;;  %v924_v8 = vmul.f32 -0.5, %v3547_v31  ;;  %vm1159_vm10 = vcmp.ne.f32.partialorder %v3419_v15, %v3419_v15  ;;  %v489_v7 = vmax.f32 %v3431_v2, 0.0 }
 0x1c1   :  { %v3580_v35 = vpop.eup %2197  ;;  %v1226_v46 = vand.u32 2147483647, %v3577_v37  ;;  %v3584_v4 = vadd.f32 10.0, %v1049_v39  ;;  %v3592_v57 = vadd.f32 %v3572_v40, %v1935_v16  ;;  %v1548_v22 = vmul.f32 %v3523_v18, %v1547_v60  ;;  %p2308_p3 = por %p2307_p2, %p2306_p1 }
 0x1c2   :  { %v2200_v48 = vpop.eup %2199  ;;  %v1426_v23 = vadd.f32 1.0, %v3580_v35  ;;  %v3598_v45 = vsub.f32 0.5, %v3575_v3  ;;  %vm1550_vm11 = vcmp.lt.f32.partialorder %v1549_v53, 0.0004427343  ;;  %v807_v29 = vmul.f32 -0.5, %v3557_v10 }
 0x1c3   :  { %v3594_v30 = vpop.eup %2201  ;;  %v1545_v12 = vmul.f32 0.6931472, %v2200_v48  ;;  %v1258_v54 = vsub.f32 0.0, %v1226_v46  ;;  %v1209_v59 = vand.u32 2147483647, %v3584_v4  ;;  %v925_v62 = vadd.f32 1.0, %v924_v8  ;;  %p2309_p4 = pnand %p2308_p3, %p2302_p0 }
 0x1c4   :  { %2213 = vlog2.f32 %v1426_v23  ;;  %v948_v44 = vadd.f32 1.0, %v3594_v30  ;;  %vm521_vm12 = vcmp.ne.f32.partialorder %v3431_v2, %v3431_v2  ;;  %v3606_v18 = vsub.f32 0.5, %v3592_v57 }
 0x1c5   :  { %v1551_v14 = vsel %vm1550_vm11, %v1548_v22, %v1545_v12  ;;  %v1317_v27 = vmul.f32 1.442695, %v1258_v54  ;;  %v1241_v33 = vsub.f32 0.0, %v1209_v59  ;;  %v3609_v21 = vadd.f32 %v3572_v40, %v1959_v49 }
 0x1c6   :  { %v1639_v55 = vadd.f32 %v1551_v14, %v1127_v58  ;;  %v927_v63 = vand.u32 2147483647, %v3547_v31  ;;  %v810_v6 = vand.u32 2147483647, %v3557_v10  ;;  %v587_v38 = vand.u32 2147483647, %v3598_v45 }
 0x1c7   :  { %2215 = vpow2.f32 %v1317_v27  ;;  %v1283_v32 = vmul.f32 1.442695, %v1241_v33  ;;  %v808_v11 = vadd.f32 1.0, %v807_v29  ;;  %v1429_v20 = vmul.f32 -0.5, %v3580_v35 }
 0x1c8   :  { %v1671_v41 = vsel %vm1159_vm10, %v3419_v15, %v1639_v55  ;;  %2217 = vlog2.f32 %v948_v44  ;;  %v926_v50 = vmul.f32 %v3547_v31, %v925_v62  ;;  %v619_v42 = vsub.f32 0.0, %v587_v38 }
 0x1c9   :  { %v2204_v0 = vpop.eup %2203  ;;  %v1703_v61 = vadd.f32 -10.0, %v1671_v41  ;;  %2219 = vpow2.f32 %v1283_v32  ;;  %v574_v36 = vand.u32 2147483647, %v3606_v18  ;;  %v3624_v43 = vsub.f32 0.5, %v3609_v21 }
 0x1ca   :  { %v3620_v24 = vpop.eup %2205  ;;  %v923_v28 = vmul.f32 0.6931472, %v2204_v0  ;;  %vm928_vm13 = vcmp.lt.f32.partialorder %v927_v63, 0.0004427343  ;;  %v476_v31 = vmax.f32 %v3447_v5, 0.0  ;;  %v809_v53 = vmul.f32 %v3557_v10, %v808_v11 }
 0x1cb   :  { %v3626_v15 = vpop.eup %2207  ;;  %v1735_v9 = vsel %vm2867_vm7, %v3397_v52, %v1703_v61  ;;  %v679_v60 = vmul.f32 1.442695, %v619_v42  ;;  %v606_v58 = vsub.f32 0.0, %v574_v36  ;;  %v3634_v46 = vadd.f32 %v3572_v40, %v295_v13 }
 0x1cc   :  { %v2210_v39 = vpop.eup %2209  ;;  %1767 = vst [vmem:[#allocation2 + $0xc0] sm:$0xff] %v1735_v9  ;;  %v929_v16 = vsel %vm928_vm13, %v926_v50, %v923_v28  ;;  %v590_v52 = vand.u32 2147483647, %v3624_v43  ;;  %v1430_v12 = vadd.f32 1.0, %v1429_v20  ;;  %vm811_vm14 = vcmp.lt.f32.partialorder %v810_v6, 0.0004427343 }
 0x1cd   :  { %v3636_v8 = vpop.eup %2211  ;;  %v1001_v48 = vadd.f32 %v929_v16, %v489_v7  ;;  %v806_v23 = vmul.f32 0.6931472, %v2210_v39  ;;  %2221 = vpow2.f32 %v679_v60  ;;  %v653_v54 = vmul.f32 1.442695, %v606_v58 }
 0x1ce   :  { %v795_v22 = vadd.f32 1.0, %v3636_v8  ;;  %v1432_v49 = vand.u32 2147483647, %v3580_v35  ;;  %v622_v29 = vsub.f32 0.0, %v590_v52  ;;  %vm508_vm15 = vcmp.ne.f32.partialorder %v3447_v5, %v3447_v5 }
 0x1cf   :  { %v1033_v10 = vsel %vm521_vm12, %v3431_v2, %v1001_v48  ;;  %v812_v59 = vsel %vm811_vm14, %v809_v53, %v806_v23  ;;  %v951_v62 = vmul.f32 -0.5, %v3594_v30  ;;  %v3649_v55 = vsub.f32 0.5, %v3634_v46 }
 0x1d0   :  { %v1065_v14 = vsub.f32 0.5, %v1033_v10  ;;  %v988_v7 = vadd.f32 %v812_v59, %v476_v31  ;;  %2223 = vlog2.f32 %v795_v22  ;;  %v685_v44 = vmul.f32 1.442695, %v622_v29 }
 0x1d1   :  { %v2214_v27 = vpop.eup %2213  ;;  %2225 = vpow2.f32 %v653_v54  ;;  %v1431_v63 = vmul.f32 %v3580_v35, %v1430_v12  ;;  %v1114_v38 = vmax.f32 %v3501_v47, 0.0  ;;  %vm1433_vm0 = vcmp.lt.f32.partialorder %v1432_v49, 0.0004427343 }
 0x1d2   :  { %v1428_v33 = vmul.f32 0.6931472, %v2214_v27  ;;  %v3652_v2 = vadd.f32 10.0, %v1065_v14  ;;  %v1020_v6 = vsel %vm508_vm15, %v3447_v5, %v988_v7  ;;  %2227 = vpow2.f32 %v685_v44 }
 0x1d3   :  { %v1052_v41 = vsub.f32 0.5, %v1020_v6  ;;  %2229 = vtanh.f32 %v3424_v51  ;;  %v954_v61 = vand.u32 2147483647, %v3594_v30  ;;  %v952_v42 = vadd.f32 1.0, %v951_v62 }
 0x1d4   :  { %v3656_v32 = vpop.eup %2215  ;;  %v1434_v11 = vsel %vm1433_vm0, %v1431_v63, %v1428_v33  ;;  %v1225_v0 = vand.u32 2147483647, %v3652_v2  ;;  %v573_v5 = vand.u32 2147483647, %v3649_v55  ;;  %vm1146_vm1 = vcmp.ne.f32.partialorder %v3501_v47, %v3501_v47 }
 0x1d5   :  { %v2218_v20 = vpop.eup %2217  ;;  %v1626_v35 = vadd.f32 %v1434_v11, %v1114_v38  ;;  %v1570_v50 = vadd.f32 1.0, %v3656_v32  ;;  %2231 = vtanh.f32 %v3492_v17  ;;  %v798_v28 = vmul.f32 -0.5, %v3636_v8 }
 0x1d6   :  { %v1257_v13 = vsub.f32 0.0, %v1225_v0  ;;  %v3667_v36 = vpop.eup %2219  ;;  %v3670_v9 = vadd.f32 10.0, %v1052_v41  ;;  %v950_v31 = vmul.f32 0.6931472, %v2218_v20  ;;  %v492_v16 = vmax.f32 %v3508_v25, 0.0 }
 0x1d7   :  { %v1658_v51 = vsel %vm1146_vm1, %v3501_v47, %v1626_v35  ;;  %2233 = vlog2.f32 %v1570_v50  ;;  %v1417_v39 = vadd.f32 1.0, %v3667_v36  ;;  %vm524_vm2 = vcmp.ne.f32.partialorder %v3508_v25, %v3508_v25 }
 0x1d8   :  { %v1690_v60 = vadd.f32 -10.0, %v1658_v51  ;;  %v1315_v53 = vmul.f32 1.442695, %v1257_v13  ;;  %v953_v17 = vmul.f32 %v3594_v30, %v952_v42  ;;  %vm955_vm3 = vcmp.lt.f32.partialorder %v954_v61, 0.0004427343 }
 0x1d9   :  { %v605_v58 = vsub.f32 0.0, %v573_v5  ;;  %2235 = vlog2.f32 %v1417_v39  ;;  %v799_v23 = vadd.f32 1.0, %v798_v28  ;;  %v801_v52 = vand.u32 2147483647, %v3636_v8 }
 0x1da   :  { %v3677_v48 = vpop.eup %2221  ;;  %v1722_v47 = vsel %vm2867_vm7, %v3537_v1, %v1690_v60  ;;  %2237 = vpow2.f32 %v1315_v53  ;;  %v1212_v12 = vand.u32 2147483647, %v3670_v9  ;;  %v956_v22 = vsel %vm955_vm3, %v953_v17, %v950_v31 }
 0x1db   :  { %1754 = vst [vmem:[#allocation2 + $0x58] sm:$0xff] %v1722_v47  ;;  %v939_v54 = vadd.f32 1.0, %v3677_v48  ;;  %v1004_v30 = vadd.f32 %v956_v22, %v492_v16  ;;  %v475_v49 = vmax.f32 %v3529_v26, 0.0  ;;  %vm507_vm4 = vcmp.ne.f32.partialorder %v3529_v26, %v3529_v26  ;;  %v375_v47 = vpop.f32.mrf.mxu1 }
 0x1dc   :  { %v491_v10 = vmax.f32 %v3598_v45, 0.0  ;;  %v1573_v59 = vmul.f32 -0.5, %v3656_v32  ;;  %v1244_v29 = vsub.f32 0.0, %v1212_v12  ;;  %v651_v14 = vmul.f32 1.442695, %v605_v58 }
 0x1dd   :  { %v2224_v1 = vpop.eup %2223  ;;  %2239 = vlog2.f32 %v939_v54  ;;  %v1036_v27 = vsel %vm524_vm2, %v3508_v25, %v1004_v30  ;;  %v800_v44 = vmul.f32 %v3636_v8, %v799_v23  ;;  %vm802_vm5 = vcmp.lt.f32.partialorder %v801_v52, 0.0004427343 }
 0x1de   :  { %v3690_v7 = vpop.eup %2225  ;;  %v797_v62 = vmul.f32 0.6931472, %v2224_v1  ;;  %v1420_v33 = vmul.f32 -0.5, %v3667_v36  ;;  %v1289_v63 = vmul.f32 1.442695, %v1244_v29  ;;  %v1068_v6 = vsub.f32 0.5, %v1036_v27 }
 0x1df   :  { %v822_v38 = vadd.f32 1.0, %v3690_v7  ;;  %v3699_v41 = vpop.eup %2227  ;;  %v1130_v11 = vmax.f32 %v3577_v37, 0.0  ;;  %v1576_v0 = vand.u32 2147483647, %v3656_v32  ;;  %2241 = vpow2.f32 %v651_v14 }
 0x1e0   :  { %v803_v61 = vsel %vm802_vm5, %v800_v44, %v797_v62  ;;  %v3703_v20 = vpop.eup %2229  ;;  %v1574_v25 = vadd.f32 1.0, %v1573_v59  ;;  %2243 = vpow2.f32 %v1289_v63  ;;  %v3705_v8 = vadd.f32 10.0, %v1068_v6 }
 0x1e1   :  { %v987_v35 = vadd.f32 %v803_v61, %v475_v49  ;;  %vm1162_vm6 = vcmp.ne.f32.partialorder %v3577_v37, %v3577_v37  ;;  %v1423_v50 = vand.u32 2147483647, %v3667_v36  ;;  %2245 = vlog2.f32 %v822_v38 }
 0x1e2   :  { %v966_v42 = vadd.f32 1.0, %v3699_v41  ;;  %v3711_v5 = vpop.eup %2231  ;;  %v1113_v13 = vmax.f32 %v3584_v4, 0.0  ;;  %v1421_v28 = vadd.f32 1.0, %v1420_v33  ;;  %v1228_v51 = vand.u32 2147483647, %v3705_v8 }
 0x1e3   :  { %v1019_v31 = vsel %vm507_vm4, %v3529_v26, %v987_v35  ;;  %vm1145_vm8 = vcmp.ne.f32.partialorder %v3584_v4, %v3584_v4  ;;  %v942_v16 = vmul.f32 -0.5, %v3677_v48  ;;  %v1575_v17 = vmul.f32 %v3656_v32, %v1574_v25 }
 0x1e4   :  { %v2234_v60 = vpop.eup %2233  ;;  %v1051_v39 = vsub.f32 0.5, %v1019_v31  ;;  %2247 = vlog2.f32 %v966_v42  ;;  %vm1577_vm9 = vcmp.lt.f32.partialorder %v1576_v0, 0.0004427343  ;;  %v1260_v58 = vsub.f32 0.0, %v1228_v51 }
 0x1e5   :  { %v1572_v53 = vmul.f32 0.6931472, %v2234_v60  ;;  %vm3723_vm10 = vcmp.lt.f32.partialorder %v1423_v50, 0.0004427343  ;;  %v945_v26 = vand.u32 2147483647, %v3677_v48  ;;  %v1422_v30 = vmul.f32 %v3667_v36, %v1421_v28 }
 0x1e6   :  { %v3727_v52 = vadd.f32 10.0, %v1051_v39  ;;  %v478_v12 = vmax.f32 %v3606_v18, 0.0  ;;  %v2236_v22 = vpop.eup %2235  ;;  %v1321_v49 = vmul.f32 1.442695, %v1260_v58  ;;  %v825_v32 = vmul.f32 -0.5, %v3690_v7 }
 0x1e7   :  { %v1578_v54 = vsel %vm1577_vm9, %v1575_v17, %v1572_v53  ;;  %v3733_v1 = vpop.eup %2237  ;;  %v1419_v29 = vmul.f32 0.6931472, %v2236_v22  ;;  %vm523_vm11 = vcmp.ne.f32.partialorder %v3598_v45, %v3598_v45  ;;  %v943_v14 = vadd.f32 1.0, %v942_v16 }
 0x1e8   :  { %v1642_v59 = vadd.f32 %v1578_v54, %v1130_v11  ;;  %v3738_v27 = vadd.f32 %v3572_v40, %v375_v47  ;;  %v1561_v62 = vadd.f32 1.0, %v3733_v1  ;;  %2249 = vpow2.f32 %v1321_v49 }
 0x1e9   :  { %v828_v44 = vand.u32 2147483647, %v3690_v7  ;;  %v969_v36 = vmul.f32 -0.5, %v3699_v41  ;;  %v1425_v6 = vsel %vm3723_vm10, %v1422_v30, %v1419_v29  ;;  %v1211_v38 = vand.u32 2147483647, %v3727_v52 }
 0x1ea   :  { %v2240_v33 = vpop.eup %2239  ;;  %v1674_v63 = vsel %vm1162_vm6, %v3577_v37, %v1642_v59  ;;  %vm3750_vm12 = vcmp.lt.f32.partialorder %v945_v26, 0.0004427343  ;;  %v1625_v0 = vadd.f32 %v1425_v6, %v1113_v13  ;;  %2251 = vlog2.f32 %v1561_v62 }
 0x1eb   :  { %v1706_v11 = vadd.f32 -10.0, %v1674_v63  ;;  %v826_v61 = vadd.f32 1.0, %v825_v32  ;;  %v1243_v25 = vsub.f32 0.0, %v1211_v38  ;;  %v941_v35 = vmul.f32 0.6931472, %v2240_v33 }
 0x1ec   :  { %v944_v50 = vmul.f32 %v3677_v48, %v943_v14  ;;  %v3756_v42 = vsub.f32 0.5, %v3738_v27  ;;  %v3758_v37 = vpop.eup %2241  ;;  %v1657_v13 = vsel %vm1145_vm8, %v3584_v4, %v1625_v0  ;;  %vm3767_vm13 = vcmp.lt.f32.partialorder %v828_v44, 0.0004427343 }
 0x1ed   :  { %v1738_v28 = vsel %vm2867_vm7, %v3551_v56, %v1706_v11  ;;  %v970_v31 = vadd.f32 1.0, %v969_v36  ;;  %v3771_v48 = vpop.eup %2243  ;;  %v1689_v60 = vadd.f32 -10.0, %v1657_v13  ;;  %v1287_v39 = vmul.f32 1.442695, %v1243_v25 }
 0x1ee   :  { %1770 = vst [vmem:[#allocation2 + $0xd8] sm:$0xff] %v1738_v28  ;;  %v947_v16 = vsel %vm3750_vm12, %v944_v50, %v941_v35  ;;  %v813_v56 = vadd.f32 1.0, %v3758_v37  ;;  %v2246_v53 = vpop.eup %2245  ;;  %v1444_v17 = vadd.f32 1.0, %v3771_v48  ;;  %v827_v58 = vmul.f32 %v3690_v7, %v826_v61 }
 0x1ef   :  { %v1003_v4 = vadd.f32 %v947_v16, %v491_v10  ;;  %v972_v47 = vand.u32 2147483647, %v3699_v41  ;;  %v1721_v23 = vsel %vm2867_vm7, %v3620_v24, %v1689_v60  ;;  %2253 = vpow2.f32 %v1287_v39 }
 0x1f0   :  { %v824_v26 = vmul.f32 0.6931472, %v2246_v53  ;;  %v589_v22 = vand.u32 2147483647, %v3756_v42  ;;  %1753 = vst [vmem:[#allocation2 + $0x50] sm:$0xff] %v1721_v23  ;;  %v1564_v30 = vmul.f32 -0.5, %v3733_v1  ;;  %2255 = vlog2.f32 %v1444_v17 }
 0x1f1   :  { %v2248_v54 = vpop.eup %2247  ;;  %v1035_v10 = vsel %vm523_vm11, %v3598_v45, %v1003_v4  ;;  %v971_v7 = vmul.f32 %v3699_v41, %v970_v31  ;;  %2257 = vlog2.f32 %v813_v56  ;;  %v1567_v59 = vand.u32 2147483647, %v3733_v1 }
 0x1f2   :  { %v1067_v49 = vsub.f32 0.5, %v1035_v10  ;;  %v830_v24 = vsel %vm3767_vm13, %v827_v58, %v824_v26  ;;  %v968_v32 = vmul.f32 0.6931472, %v2248_v54  ;;  %v494_v14 = vmax.f32 %v3624_v43, 0.0 }
 0x1f3   :  { %v990_v29 = vadd.f32 %v830_v24, %v478_v12  ;;  %vm973_vm14 = vcmp.lt.f32.partialorder %v972_v47, 0.0004427343  ;;  %vm510_vm15 = vcmp.ne.f32.partialorder %v3606_v18, %v3606_v18  ;;  %v621_v44 = vsub.f32 0.0, %v589_v22 }
 0x1f4   :  { %v3795_v62 = vadd.f32 10.0, %v1067_v49  ;;  %v974_v45 = vsel %vm973_vm14, %v971_v7, %v968_v32  ;;  %v1565_v41 = vadd.f32 1.0, %v1564_v30  ;;  %vm526_vm0 = vcmp.ne.f32.partialorder %v3624_v43, %v3624_v43 }
 0x1f5   :  { %v1022_v36 = vsel %vm510_vm15, %v3606_v18, %v990_v29  ;;  %v1006_v33 = vadd.f32 %v974_v45, %v494_v14  ;;  %v3802_v63 = vpop.eup %2249  ;;  %v1447_v12 = vmul.f32 -0.5, %v3771_v48  ;;  %v477_v40 = vmax.f32 %v3649_v55, 0.0 }
 0x1f6   :  { %v1227_v6 = vand.u32 2147483647, %v3795_v62  ;;  %v1054_v38 = vsub.f32 0.5, %v1022_v36  ;;  %vm3807_vm1 = vcmp.lt.f32.partialorder %v1567_v59, 0.0004427343  ;;  %v1588_v0 = vadd.f32 1.0, %v3802_v63 }
 0x1f7   :  { %v1038_v18 = vsel %vm526_vm0, %v3624_v43, %v1006_v33  ;;  %v816_v61 = vmul.f32 -0.5, %v3758_v37  ;;  %v2252_v25 = vpop.eup %2251  ;;  %v683_v13 = vmul.f32 1.442695, %v621_v44  ;;  %v1566_v31 = vmul.f32 %v3733_v1, %v1565_v41 }
 0x1f8   :  { %v1259_v35 = vsub.f32 0.0, %v1227_v6  ;;  %v3814_v50 = vadd.f32 10.0, %v1054_v38  ;;  %v1070_v28 = vsub.f32 0.5, %v1038_v18  ;;  %v1563_v51 = vmul.f32 0.6931472, %v2252_v25 }
 0x1f9   :  { %v1450_v60 = vand.u32 2147483647, %v3771_v48  ;;  %2259 = vlog2.f32 %v1588_v0  ;;  %v1129_v39 = vmax.f32 %v3652_v2, 0.0  ;;  %v1448_v16 = vadd.f32 1.0, %v1447_v12 }
 0x1fa   :  { %v1319_v56 = vmul.f32 1.442695, %v1259_v35  ;;  %v1214_v43 = vand.u32 2147483647, %v3814_v50  ;;  %v1569_v53 = vsel %vm3807_vm1, %v1566_v31, %v1563_v51  ;;  %v3822_v17 = vadd.f32 10.0, %v1070_v28 }
 0x1fb   :  { %v817_v4 = vadd.f32 1.0, %v816_v61  ;;  %2261 = vpow2.f32 %v683_v13  ;;  %v1641_v58 = vadd.f32 %v1569_v53, %v1129_v39  ;;  %v819_v1 = vand.u32 2147483647, %v3758_v37 }
 0x1fc   :  { %2263 = vpow2.f32 %v1319_v56  ;;  %v1246_v47 = vsub.f32 0.0, %v1214_v43  ;;  %v3825_v23 = vpop.eup %2253  ;;  %vm1161_vm2 = vcmp.ne.f32.partialorder %v3652_v2, %v3652_v2  ;;  %v1116_v26 = vmax.f32 %v3670_v9, 0.0 }
 0x1fd   :  { %vm3830_vm3 = vcmp.lt.f32.partialorder %v1450_v60, 0.0004427343  ;;  %v1230_v54 = vand.u32 2147483647, %v3822_v17  ;;  %v2256_v30 = vpop.eup %2255  ;;  %v1673_v10 = vsel %vm1161_vm2, %v3652_v2, %v1641_v58  ;;  %v1449_v7 = vmul.f32 %v3771_v48, %v1448_v16 }
 0x1fe   :  { %v1591_v49 = vmul.f32 -0.5, %v3802_v63  ;;  %v1435_v24 = vadd.f32 1.0, %v3825_v23  ;;  %v2258_v32 = vpop.eup %2257  ;;  %v1705_v59 = vadd.f32 -10.0, %v1673_v10  ;;  %v1446_v29 = vmul.f32 0.6931472, %v2256_v30 }
 0x1ff   :  { %v1293_v14 = vmul.f32 1.442695, %v1246_v47  ;;  %v1262_v45 = vsub.f32 0.0, %v1230_v54  ;;  %v815_v44 = vmul.f32 0.6931472, %v2258_v32  ;;  %v818_v41 = vmul.f32 %v3758_v37, %v817_v4 }
 0x200   :  { %2265 = vlog2.f32 %v1435_v24  ;;  %vm820_vm4 = vcmp.lt.f32.partialorder %v819_v1, 0.0004427343  ;;  %v1737_v2 = vsel %vm2867_vm7, %v3626_v15, %v1705_v59  ;;  %v1452_v48 = vsel %vm3830_vm3, %v1449_v7, %v1446_v29 }
 0x201   :  { %2267 = vpow2.f32 %v1293_v14  ;;  %v1325_v36 = vmul.f32 1.442695, %v1262_v45  ;;  %1769 = vst [vmem:[#allocation2 + $0xd0] sm:$0xff] %v1737_v2  ;;  %v1628_v33 = vadd.f32 %v1452_v48, %v1116_v26  ;;  %v821_v12 = vsel %vm820_vm4, %v818_v41, %v815_v44 }
 0x202   :  { %vm1148_vm5 = vcmp.ne.f32.partialorder %v3670_v9, %v3670_v9  ;;  %v1592_v6 = vadd.f32 1.0, %v1591_v49  ;;  %v989_v38 = vadd.f32 %v821_v12, %v477_v40  ;;  %v1594_v11 = vand.u32 2147483647, %v3802_v63 }
 0x203   :  { %2269 = vpow2.f32 %v1325_v36  ;;  %v1660_v37 = vsel %vm1148_vm5, %v3670_v9, %v1628_v33  ;;  %vm509_vm6 = vcmp.ne.f32.partialorder %v3649_v55, %v3649_v55  ;;  %v1438_v61 = vmul.f32 -0.5, %v3825_v23 }
 0x204   :  { %v1692_v15 = vadd.f32 -10.0, %v1660_v37  ;;  %v1021_v0 = vsel %vm509_vm6, %v3649_v55, %v989_v38  ;;  %v1593_v40 = vmul.f32 %v3802_v63, %v1592_v6  ;;  %v1132_v13 = vmax.f32 %v3705_v8, 0.0 }
 0x205   :  { %v1053_v25 = vsub.f32 0.5, %v1021_v0  ;;  %vm1595_vm8 = vcmp.lt.f32.partialorder %v1594_v11, 0.0004427343  ;;  %2271 = vtanh.f32 %v3518_v34  ;;  %v1439_v16 = vadd.f32 1.0, %v1438_v61 }
 0x206   :  { %v2260_v18 = vpop.eup %2259  ;;  %v1724_v35 = vsel %vm2867_vm7, %v3703_v20, %v1692_v15  ;;  %vm1164_vm9 = vcmp.ne.f32.partialorder %v3705_v8, %v3705_v8  ;;  %v1441_v20 = vand.u32 2147483647, %v3825_v23  ;;  %v1115_v22 = vmax.f32 %v3727_v52, 0.0 }
 0x207   :  { %v1590_v28 = vmul.f32 0.6931472, %v2260_v18  ;;  %1756 = vst [vmem:[#allocation2 + $0x68] sm:$0xff] %v1724_v35  ;;  %v3859_v51 = vadd.f32 10.0, %v1053_v25  ;;  %v1440_v1 = vmul.f32 %v3825_v23, %v1439_v16  ;;  %vm1147_vm11 = vcmp.ne.f32.partialorder %v3727_v52, %v3727_v52 }
 0x208   :  { %v2262_v9 = vpop.eup %2261  ;;  %vm1442_vm10 = vcmp.lt.f32.partialorder %v1441_v20, 0.0004427343  ;;  %v493_v38 = vmax.f32 %v3756_v42, 0.0  ;;  %v1131_v37 = vmax.f32 %v3795_v62, 0.0  ;;  %vm525_vm14 = vcmp.ne.f32.partialorder %v3756_v42, %v3756_v42 }
 0x209   :  { %v2264_v55 = vpop.eup %2263  ;;  %v1596_v31 = vsel %vm1595_vm8, %v1593_v40, %v1590_v28  ;;  %v957_v60 = vadd.f32 1.0, %v2262_v9  ;;  %v1213_v63 = vand.u32 2147483647, %v3859_v51  ;;  %v960_v49 = vmul.f32 -0.5, %v2262_v9 }
 0x20a   :  { %v1644_v39 = vadd.f32 %v1596_v31, %v1132_v13  ;;  %v1579_v56 = vadd.f32 1.0, %v2264_v55  ;;  %v1582_v23 = vmul.f32 -0.5, %v2264_v55  ;;  %v963_v44 = vand.u32 2147483647, %v2262_v9 }
 0x20b   :  { %2273 = vlog2.f32 %v957_v60  ;;  %v1245_v4 = vsub.f32 0.0, %v1213_v63  ;;  %v961_v29 = vadd.f32 1.0, %v960_v49  ;;  %v1585_v41 = vand.u32 2147483647, %v2264_v55 }
 0x20c   :  { %v1676_v43 = vsel %vm1164_vm9, %v3705_v8, %v1644_v39  ;;  %2275 = vlog2.f32 %v1579_v56  ;;  %v1583_v45 = vadd.f32 1.0, %v1582_v23  ;;  %vm964_vm12 = vcmp.lt.f32.partialorder %v963_v44, 0.0004427343 }
 0x20d   :  { %v2266_v34 = vpop.eup %2265  ;;  %v1708_v53 = vadd.f32 -10.0, %v1676_v43  ;;  %v1291_v10 = vmul.f32 1.442695, %v1245_v4  ;;  %v962_v33 = vmul.f32 %v2262_v9, %v961_v29  ;;  %vm1586_vm13 = vcmp.lt.f32.partialorder %v1585_v41, 0.0004427343 }
 0x20e   :  { %v3866_v58 = vpop.eup %2267  ;;  %v1437_v47 = vmul.f32 0.6931472, %v2266_v34  ;;  %v1584_v6 = vmul.f32 %v2264_v55, %v1583_v45  ;;  %vm1163_vm15 = vcmp.ne.f32.partialorder %v3795_v62, %v3795_v62  ;;  %v1118_v16 = vmax.f32 %v3814_v50, 0.0 }
 0x20f   :  { %v1740_v26 = vsel %vm2867_vm7, %v3711_v5, %v1708_v53  ;;  %v1462_v54 = vadd.f32 1.0, %v3866_v58  ;;  %v1465_v2 = vmul.f32 -0.5, %v3866_v58  ;;  %v1468_v18 = vand.u32 2147483647, %v3866_v58 }
 0x210   :  { %v3874_v30 = vpop.eup %2269  ;;  %1772 = vst [vmem:[#allocation2 + $0xe8] sm:$0xff] %v1740_v26  ;;  %v1443_v8 = vsel %vm1442_vm10, %v1440_v1, %v1437_v47  ;;  %vm1150_vm1 = vcmp.ne.f32.partialorder %v3814_v50, %v3814_v50  ;;  %v1134_v4 = vmax.f32 %v3822_v17, 0.0  ;;  %vm1166_vm3 = vcmp.ne.f32.partialorder %v3822_v17, %v3822_v17 }
 0x211   :  { %v1627_v7 = vadd.f32 %v1443_v8, %v1115_v22  ;;  %2277 = vlog2.f32 %v1462_v54  ;;  %v1606_v24 = vadd.f32 1.0, %v3874_v30  ;;  %v1466_v11 = vadd.f32 1.0, %v1465_v2 }
 0x212   :  { %2279 = vpow2.f32 %v1291_v10  ;;  %v2272_v59 = vpop.eup %2271  ;;  %v1612_v28 = vand.u32 2147483647, %v3874_v30  ;;  %vm1469_vm0 = vcmp.lt.f32.partialorder %v1468_v18, 0.0004427343  ;;  %v1117_v45 = vmax.f32 %v3859_v51, 0.0 }
 0x213   :  { %v1659_v5 = vsel %vm1147_vm11, %v3727_v52, %v1627_v7  ;;  %2281 = vtanh.f32 %v3575_v3  ;;  %v1609_v52 = vmul.f32 -0.5, %v3874_v30  ;;  %vm1149_vm5 = vcmp.ne.f32.partialorder %v3859_v51, %v3859_v51 }
 0x214   :  { %v1691_v32 = vadd.f32 -10.0, %v1659_v5  ;;  %2283 = vlog2.f32 %v1606_v24  ;;  %vm1613_vm2 = vcmp.lt.f32.partialorder %v1612_v28, 0.0004427343 }
 0x215   :  { %2285 = vtanh.f32 %v3592_v57  ;;  %v1610_v25 = vadd.f32 1.0, %v1609_v52 }
 0x216   :  { %v1723_v14 = vsel %vm2867_vm7, %v2272_v59, %v1691_v32  ;;  %2287 = vtanh.f32 %v3609_v21  ;;  %v1467_v21 = vmul.f32 %v3866_v58, %v1466_v11 }
 0x217   :  { %1755 = vst [vmem:[#allocation2 + $0x60] sm:$0xff] %v1723_v14  ;;  %v1611_v43 = vmul.f32 %v3874_v30, %v1610_v25 }
 0x218   :  { %v2274_v48 = vpop.eup %2273 }
 0x219   :  { %v2276_v36 = vpop.eup %2275  ;;  %v959_v3 = vmul.f32 0.6931472, %v2274_v48 }
 0x21a   :  { %v1581_v12 = vmul.f32 0.6931472, %v2276_v36 }
 0x21b   :  { %v965_v15 = vsel %vm964_vm12, %v962_v33, %v959_v3 }
 0x21c   :  { %v1587_v0 = vsel %vm1586_vm13, %v1584_v6, %v1581_v12  ;;  %v1005_v57 = vadd.f32 %v965_v15, %v493_v38 }
 0x21d   :  { %v1643_v61 = vadd.f32 %v1587_v0, %v1131_v37 }
 0x21e   :  { %v2278_v35 = vpop.eup %2277  ;;  %v1037_v40 = vsel %vm525_vm14, %v3756_v42, %v1005_v57 }
 0x21f   :  { %v2280_v9 = vpop.eup %2279  ;;  %v1675_v13 = vsel %vm1163_vm15, %v3795_v62, %v1643_v61  ;;  %v1464_v55 = vmul.f32 0.6931472, %v2278_v35  ;;  %v1069_v31 = vsub.f32 0.5, %v1037_v40 }
 0x220   :  { %v2282_v60 = vpop.eup %2281  ;;  %v1707_v39 = vadd.f32 -10.0, %v1675_v13  ;;  %v1453_v56 = vadd.f32 1.0, %v2280_v9  ;;  %v1456_v49 = vmul.f32 -0.5, %v2280_v9  ;;  %v1459_v32 = vand.u32 2147483647, %v2280_v9 }
 0x221   :  { %v2284_v20 = vpop.eup %2283  ;;  %v1470_v63 = vsel %vm1469_vm0, %v1467_v21, %v1464_v55  ;;  %v1854_v34 = vadd.f32 10.0, %v1069_v31 }
 0x222   :  { %v1739_v42 = vsel %vm2867_vm7, %v2282_v60, %v1707_v39  ;;  %v1630_v53 = vadd.f32 %v1470_v63, %v1118_v16  ;;  %v1608_v62 = vmul.f32 0.6931472, %v2284_v20  ;;  %2289 = vlog2.f32 %v1453_v56  ;;  %v2286_v54 = vpop.eup %2285 }
 0x223   :  { %1771 = vst [vmem:[#allocation2 + $0xe0] sm:$0xff] %v1739_v42  ;;  %v1229_v1 = vand.u32 2147483647, %v1854_v34  ;;  %v2288_v24 = vpop.eup %2287  ;;  %2291 = vtanh.f32 %v3634_v46  ;;  %v1457_v5 = vadd.f32 1.0, %v1456_v49  ;;  %vm1460_vm4 = vcmp.lt.f32.partialorder %v1459_v32, 0.0004427343 }
 0x224   :  { %v1662_v58 = vsel %vm1150_vm1, %v3814_v50, %v1630_v53  ;;  %v1614_v47 = vsel %vm1613_vm2, %v1611_v43, %v1608_v62  ;;  %v1133_v11 = vmax.f32 %v1854_v34, 0.0  ;;  %vm1165_vm8 = vcmp.ne.f32.partialorder %v1854_v34, %v1854_v34 }
 0x225   :  { %v1694_v26 = vadd.f32 -10.0, %v1662_v58  ;;  %v1646_v22 = vadd.f32 %v1614_v47, %v1134_v4  ;;  %v1261_v30 = vsub.f32 0.0, %v1229_v1  ;;  %v1458_v14 = vmul.f32 %v2280_v9, %v1457_v5 }
 0x227   :  { %v1726_v8 = vsel %vm2867_vm7, %v2286_v54, %v1694_v26  ;;  %v1678_v10 = vsel %vm1166_vm3, %v3822_v17, %v1646_v22  ;;  %v1323_v23 = vmul.f32 1.442695, %v1261_v30 }
 0x228   :  { %1758 = vst [vmem:[#allocation2 + $0x78] sm:$0xff] %v1726_v8  ;;  %v1710_v7 = vadd.f32 -10.0, %v1678_v10 }
 0x229   :  { %2293 = vpow2.f32 %v1323_v23 }
 0x22a   :  { %v1742_v50 = vsel %vm2867_vm7, %v2288_v24, %v1710_v7 }
 0x22b   :  { %1774 = vst [vmem:[#allocation2 + $0xf8] sm:$0xff] %v1742_v50 }
 0x22f   :  { %v2290_v59 = vpop.eup %2289 }
 0x230   :  { %v1455_v29 = vmul.f32 0.6931472, %v2290_v59  ;;  %v2292_v41 = vpop.eup %2291 }
 0x232   :  { %v1461_v17 = vsel %vm1460_vm4, %v1458_v14, %v1455_v29 }
 0x233   :  { %v1629_v44 = vadd.f32 %v1461_v17, %v1117_v45 }
 0x235   :  { %v1661_v46 = vsel %vm1149_vm5, %v3859_v51, %v1629_v44 }
 0x236   :  { %v1693_v2 = vadd.f32 -10.0, %v1661_v46  ;;  %v2294_v48 = vpop.eup %2293 }
 0x237   :  { %v1597_v52 = vadd.f32 1.0, %v2294_v48  ;;  %v1600_v3 = vmul.f32 -0.5, %v2294_v48  ;;  %v1603_v12 = vand.u32 2147483647, %v2294_v48 }
 0x238   :  { %v1725_v36 = vsel %vm2867_vm7, %v2292_v41, %v1693_v2 }
 0x239   :  { %1757 = vst [vmem:[#allocation2 + $0x70] sm:$0xff] %v1725_v36  ;;  %2295 = vlog2.f32 %v1597_v52  ;;  %v1601_v33 = vadd.f32 1.0, %v1600_v3  ;;  %vm1604_vm6 = vcmp.lt.f32.partialorder %v1603_v12, 0.0004427343 }
 0x23a   :  { %2297 = vtanh.f32 %v3738_v27 }
 0x23b   :  { %v1602_v37 = vmul.f32 %v2294_v48, %v1601_v33 }
 0x246   :  { %v2296_v6 = vpop.eup %2295 }
 0x247   :  { %v1599_v38 = vmul.f32 0.6931472, %v2296_v6  ;;  %v2298_v57 = vpop.eup %2297 }
 0x249   :  { %v1605_v51 = vsel %vm1604_vm6, %v1602_v37, %v1599_v38 }
 0x24a   :  { %v1645_v15 = vadd.f32 %v1605_v51, %v1133_v11 }
 0x24c   :  { %v1677_v0 = vsel %vm1165_vm8, %v1854_v34, %v1645_v15 }
 0x24d   :  { %v1709_v18 = vadd.f32 -10.0, %v1677_v0 }
 0x24f   :  { %v1741_v61 = vsel %vm2867_vm7, %v2298_v57, %v1709_v18 }
 0x250   :  { %1773 = vst [vmem:[#allocation2 + $0xf0] sm:$0xff] %v1741_v61 }
 0x251   :  { %2312 = shalt.err (!%p2309_p4)
}
 0x252   :  { %s2324_s15 = smov 128   ;;  %s2325_s16 = smov 8  }
 0x253   :  { %1786 = dma.vmem_to_hbm [thread:$0]  %s1781_s13, 4096, %s3929_s3, [#allocation3], %s2324_s15, %s2324_s15, %s2325_s16  }
 0x254   :  { %2321 = dma.done.wait [#allocation3], 4096  }
 0x255   :  { %2322 = vsyncadd [#allocation3], 4294963200 }
 0x256   :  { %1790 = vsyncpa [#allocation3], 1 }

</bundles_post_ra>
